<compile_context>
chip_gen: v7x
topology: tpu7x:2x2x1
jax: 0.10.0
libtpu: 0.0.40
codegen_flags: <defaults>
</compile_context>

<pallas_src>
import jax
import jax.numpy as jnp
import numpy as np
from jax.experimental import pallas as pl
from jax.experimental.pallas import tpu as pltpu


# ----------------------------------- Pallas kernel ---------------------------------------------

def _mrconv_kernel(x_ref, nbr_ref, wx_ref, wj_ref, b_ref, o_ref):
    """One node-tile step of MRConv + Linear(2*C_in -> C_out) + ReLU.

    x_ref:   [TN, C_in]          node features (stream dtype)
    nbr_ref: [TN, K_p, C_in]     relative features x[src]-x[dst] per neighbor slot,
                                 padded slots filled with -1e30 (stream dtype)
    wx_ref:  [C_in, C_out_p]     W.T rows that multiply x   (stream dtype, VMEM resident)
    wj_ref:  [C_in, C_out_p]     W.T rows that multiply x_j (stream dtype, VMEM resident)
    b_ref:   [1, C_out_p] f32    bias (VMEM resident)
    o_ref:   [TN, C_out_p] f32   output tile (lane-dense)
    """
    # structured segment-max: plain max over the per-node neighbor-slot axis (O(TN*K*C) VPU work)
    x_j = jnp.max(nbr_ref[...], axis=1).astype(jnp.float32)          # [TN, C_in]
    # torch scatter_('max', ...): out[out < -10000] = 0 (also zeroes nodes without in-edges;
    # note legitimate diffs below -10000 are intentionally zeroed — matches the reference).
    x_j = jnp.where(x_j < -10000.0, 0.0, x_j)
    # split-weight epilogue: concat([x, x_j]) @ W.T == x @ Wx + x_j @ Wj  (no cross-lane concat)
    out = jnp.dot(x_ref[...], wx_ref[...], preferred_element_type=jnp.float32)
    out = out + jnp.dot(x_j.astype(wj_ref.dtype), wj_ref[...],
                        preferred_element_type=jnp.float32)
    out = out + b_ref[...]
    o_ref[...] = jnp.maximum(out, 0.0).astype(o_ref.dtype)           # act='relu'


def _round_up(v, m):
    return ((v + m - 1) // m) * m


def _pick_tn(n, tn):
    """Tile size: multiple of 8, <= padded N, and >= 2 node tiles when possible (v7x: 2 TCs)."""
    tn = min(tn, _round_up(n, 8))
    if n > 8:
        tn = min(tn, _round_up((n + 1) // 2, 8))
    return max(tn, 8)


def _mrconv_call(x_p, nbr_p, wx, wj, b_pad, tn):
    n_p, c_in = x_p.shape
    k_p = nbr_p.shape[1]
    c_out_p = wx.shape[1]
    return pl.pallas_call(
        _mrconv_kernel,
        out_shape=jax.ShapeDtypeStruct((n_p, c_out_p), jnp.float32),
        grid_spec=pltpu.PrefetchScalarGridSpec(
            num_scalar_prefetch=0,
            grid=(n_p // tn,),
            in_specs=[
                pl.BlockSpec((tn, c_in), lambda i: (i, 0)),            # x node tile
                pl.BlockSpec((tn, k_p, c_in), lambda i: (i, 0, 0)),    # per-node neighbor diffs
                pl.BlockSpec((c_in, c_out_p), lambda i: (0, 0)),       # Wx, VMEM resident
                pl.BlockSpec((c_in, c_out_p), lambda i: (0, 0)),       # Wj, VMEM resident
                pl.BlockSpec((1, c_out_p), lambda i: (0, 0)),          # bias, VMEM resident
            ],
            out_specs=pl.BlockSpec((tn, c_out_p), lambda i: (i, 0)),   # lane-dense output tile
        ),
        compiler_params=pltpu.CompilerParams(
            dimension_semantics=("parallel",),
        ),
    )(x_p, nbr_p, wx, wj, b_pad)


# -------------------------------------- wrappers ------------------------------------------------

def prepare_mrconv_params(w, b, lane=128):
    """Once-per-layer weight prep: W [C_out, 2*C_in] -> (Wx, Wj, bias) padded lane-dense."""
    c_out, two_c_in = w.shape
    c_in = two_c_in // 2
    c_out_p = _round_up(max(c_out, lane), lane)
    wt = w.T.astype(jnp.float32)                                     # [2*C_in, C_out]
    wx = jnp.pad(wt[:c_in], ((0, 0), (0, c_out_p - c_out)))          # multiplies x
    wj = jnp.pad(wt[c_in:], ((0, 0), (0, c_out_p - c_out)))          # multiplies x_j
    b_pad = jnp.pad(b.astype(jnp.float32), (0, c_out_p - c_out)).reshape(1, c_out_p)
    return wx, wj, b_pad, c_out


def graph_conv_mr_knn(x, nn_idx, params, *, tn=256, stream_dtype=jnp.float32):
    """MRConv + Linear + ReLU for a fixed-k neighbor list nn_idx [N, k] (src=nn_idx, dst=row).

    stream_dtype: bf16 recommended on v6e/v7x (halves HBM/VMEM traffic, bf16 VPU/MXU);
    keep f32 on v5e. Accumulation, sentinel and clamp stay in f32 regardless.
    """
    wx, wj, b_pad, c_out = params
    n, c_in = x.shape
    k = nn_idx.shape[1]
    tn = _pick_tn(n, tn)
    n_p = _round_up(n, tn)
    k_p = _round_up(max(k, 8), 8)

    diff = x[nn_idx] - x[:, None, :]                                 # [N, k, C_in] (XLA gather)
    nbr = jnp.pad(diff, ((0, n_p - n), (0, k_p - k), (0, 0)),
                  constant_values=-1e30).astype(stream_dtype)
    x_p = jnp.pad(x.astype(jnp.float32), ((0, n_p - n), (0, 0))).astype(stream_dtype)
    out = _mrconv_call(x_p, nbr,
                       wx.astype(stream_dtype), wj.astype(stream_dtype), b_pad, tn)
    return out[:n, :c_out]


def graph_conv_mr_edges(x, edge_index, params, *, tn=256, stream_dtype=jnp.float32,
                        max_degree=None):
    """MRConv + Linear + ReLU for an arbitrary edge_index [2, E] (row 0 = src, row 1 = dst).

    Sorted-dst plan: edges are bucketed by destination into a [N, max_deg_p, C_in] slab in the
    wrapper (padded slots = -1e30), so the kernel does O(N * max_deg * C) work, not O(N * E * C).
    """
    wx, wj, b_pad, c_out = params
    n, c_in = x.shape
    src = edge_index[0].astype(jnp.int32)
    dst = edge_index[1].astype(jnp.int32)
    e = src.shape[0]

    counts = jnp.zeros((n,), jnp.int32).at[dst].add(1)
    if max_degree is None:
        # TODO(synk): pass a static max_degree when calling this under jit.
        max_degree = int(jax.device_get(jnp.max(counts)))
    max_degree = max(int(max_degree), 1)

    order = jnp.argsort(dst)                                         # stable sort by destination
    src_s, dst_s = src[order], dst[order]
    starts = jnp.cumsum(counts) - counts                             # exclusive prefix of degrees
    slot = jnp.arange(e, dtype=jnp.int32) - starts[dst_s]            # position within dst bucket

    tn = _pick_tn(n, tn)
    n_p = _round_up(n, tn)
    k_p = _round_up(max(max_degree, 8), 8)

    diff = x[src_s] - x[dst_s]                                       # [E, C_in]
    nbr = jnp.full((n_p, k_p, c_in), -1e30, jnp.float32).at[dst_s, slot].set(diff)
    nbr = nbr.astype(stream_dtype)
    x_p = jnp.pad(x.astype(jnp.float32), ((0, n_p - n), (0, 0))).astype(stream_dtype)
    out = _mrconv_call(x_p, nbr,
                       wx.astype(stream_dtype), wj.astype(stream_dtype), b_pad, tn)
    return out[:n, :c_out]


# ---------- dynamic-graph construction (DilatedKnnGraph, batch=None) — plain-JAX glue ----------

def _pairwise_distance(xb):
    x_inner = -2.0 * jnp.matmul(xb, jnp.swapaxes(xb, 2, 1))
    x_square = jnp.sum(xb * xb, axis=-1, keepdims=True)
    return x_square + x_inner + jnp.swapaxes(x_square, 2, 1)


def knn_graph_matrix_jax(x, k=16):
    """edge_index [2, N*k] int32: row 0 = neighbor (src), row 1 = center (dst)."""
    n = x.shape[0]
    neg_adj = -_pairwise_distance(x[None])                           # [1, N, N]
    _, nn_idx = jax.lax.top_k(neg_adj, k)                            # [1, N, k]
    nn_idx = nn_idx.reshape(1, -1).astype(jnp.int32)
    center_idx = jnp.repeat(jnp.arange(n, dtype=jnp.int32), k).reshape(1, -1)
    return jnp.concatenate([nn_idx, center_idx], axis=0)


def plain_dyn_block(x, params, batch=None, edge_index=None, *, k=9, dilation=1,
                    tn=256, stream_dtype=jnp.float32):
    """PlainDynBlock.forward: (DynConv(channels, channels, conv='mr')(x, batch, edge_index), batch)."""
    if edge_index is None:
        # DilatedKnnGraph (batch=None, deterministic branch): k*dilation nearest neighbours per
        # node, then every `dilation`-th.  Since the torch edge stream is node-major with
        # k*dilation edges per node, edge_index[:, ::dilation] == nn_idx[:, ::dilation].
        neg_adj = -_pairwise_distance(x[None])                       # [1, N, N]
        _, nn_idx = jax.lax.top_k(neg_adj, k * dilation)             # [1, N, k*dilation]
        nn_idx = nn_idx[0, :, ::dilation].astype(jnp.int32)          # [N, k]
        out = graph_conv_mr_knn(x, nn_idx, params, tn=tn, stream_dtype=stream_dtype)
    else:
        out = graph_conv_mr_edges(x, edge_index, params, tn=tn, stream_dtype=stream_dtype)
    return out, batch


# ------------------------------------ pure-JAX reference ---------------------------------------

def _reference(x, edge_index, w, b):
    n = x.shape[0]
    src, dst = edge_index[0], edge_index[1]
    diff = x[src] - x[dst]
    x_j = jax.ops.segment_max(diff, dst, num_segments=n)
    x_j = jnp.where(x_j < -10000.0, 0.0, x_j)
    h = jnp.concatenate([x, x_j], axis=1)
    return jnp.maximum(h @ w.T + b, 0.0)


if __name__ == "__main__":
    key = jax.random.PRNGKey(0)
    k_x, k_w, k_b = jax.random.split(key, 3)

    N, channels, k_nn, dilation = 128, 64, 9, 1
    x = jax.random.normal(k_x, (N, channels), dtype=jnp.float32)

    # Linear(2*channels, channels) params (deterministic synthetic init)
    fan_in = 2 * channels
    bound = 1.0 / np.sqrt(fan_in)
    w = jax.random.uniform(k_w, (channels, 2 * channels), minval=-bound, maxval=bound,
                           dtype=jnp.float32)
    b = jax.random.uniform(k_b, (channels,), minval=-bound, maxval=bound, dtype=jnp.float32)

    params = prepare_mrconv_params(w, b)     # hoisted once-per-layer weight prep (Wx / Wj split)

    # pure-JAX reference on the same deterministic KNN graph
    ei = knn_graph_matrix_jax(x, k_nn * dilation)[:, ::dilation]
    ref = _reference(x, ei, w, b)

    # 1) dynamic-graph path (edge_index=None), f32 streaming
    out, out_batch = plain_dyn_block(x, params, batch=None, edge_index=None,
                                     k=k_nn, dilation=dilation)
    jax.block_until_ready(out)
    assert out.shape == (N, channels) and out_batch is None
    np.testing.assert_allclose(np.asarray(out), np.asarray(ref), rtol=2e-4, atol=2e-4)

    # 2) user-supplied edge_index path (sorted-dst bucketed general path)
    out2, _ = plain_dyn_block(x, params, batch=None, edge_index=ei)
    jax.block_until_ready(out2)
    np.testing.assert_allclose(np.asarray(out2), np.asarray(ref), rtol=2e-4, atol=2e-4)

    # 3) bf16-streamed variant (recommended on v6e/v7x; keep f32 on v5e) — looser tolerance
    out3, _ = plain_dyn_block(x, params, batch=None, edge_index=None,
                              k=k_nn, dilation=dilation, stream_dtype=jnp.bfloat16)
    jax.block_until_ready(out3)
    np.testing.assert_allclose(np.asarray(out3), np.asarray(ref), rtol=5e-2, atol=5e-2)

    print("KERNEL_OK")
</pallas_src>

<mosaic_0001>
module attributes {stable_mosaic.version = 11 : i64} {
  func.func @_mrconv_kernel(%arg0: i32, %arg1: memref<64x64xf32, #tpu.memory_space<vmem>>, %arg2: memref<64x16x64xf32, #tpu.memory_space<vmem>>, %arg3: memref<64x128xf32, #tpu.memory_space<vmem>>, %arg4: memref<64x128xf32, #tpu.memory_space<vmem>>, %arg5: memref<1x128xf32, #tpu.memory_space<vmem>>, %arg6: memref<64x128xf32, #tpu.memory_space<vmem>>) attributes {dimension_semantics = [#tpu.dimension_semantics<parallel>], iteration_bounds = array<i64: 2>, scalar_prefetch = 0 : i64, scratch_operands = 0 : i64, tpu.core_type = #tpu.core_type<tc>, window_params = [{transform_indices = @transform_0, window_bounds = array<i64: 64, 64>}, {transform_indices = @transform_1, window_bounds = array<i64: 64, 16, 64>}, {pipeline_mode = #tpu.pipeline_mode<synchronous>, transform_indices = @transform_2, window_bounds = array<i64: 64, 128>}, {pipeline_mode = #tpu.pipeline_mode<synchronous>, transform_indices = @transform_3, window_bounds = array<i64: 64, 128>}, {pipeline_mode = #tpu.pipeline_mode<synchronous>, transform_indices = @transform_4, window_bounds = array<i64: 1, 128>}, {transform_indices = @transform_5, window_bounds = array<i64: 64, 128>}]} {
    %c0 = arith.constant 0 : index
    %c0_0 = arith.constant 0 : index
    %c0_1 = arith.constant 0 : index
    %0 = vector.load %arg2[%c0, %c0_0, %c0_1] : memref<64x16x64xf32, #tpu.memory_space<vmem>>, vector<64x16x64xf32>
    %cst = arith.constant dense<0xFF800000> : vector<64x64xf32>
    %1 = vector.multi_reduction <maximumf>, %0, %cst [1] : vector<64x16x64xf32> to vector<64x64xf32>
    %cst_2 = arith.constant -1.000000e+04 : f32
    %2 = vector.broadcast %cst_2 : f32 to vector<64x64xf32>
    %3 = arith.cmpf olt, %1, %2 : vector<64x64xf32>
    %cst_3 = arith.constant 0.000000e+00 : f32
    %4 = vector.broadcast %cst_3 : f32 to vector<64x64xf32>
    %5 = arith.select %3, %4, %1 : vector<64x64xi1>, vector<64x64xf32>
    %c0_4 = arith.constant 0 : index
    %c0_5 = arith.constant 0 : index
    %6 = vector.load %arg1[%c0_4, %c0_5] : memref<64x64xf32, #tpu.memory_space<vmem>>, vector<64x64xf32>
    %c0_6 = arith.constant 0 : index
    %c0_7 = arith.constant 0 : index
    %7 = vector.load %arg3[%c0_6, %c0_7] : memref<64x128xf32, #tpu.memory_space<vmem>>, vector<64x128xf32>
    %cst_8 = arith.constant dense<0.000000e+00> : vector<64x128xf32>
    %8 = tpu.matmul %6, %7, %cst_8 {dimension_numbers = #tpu.dot_dimension_numbers<[1], [0], [0], [1], [0, 0, 1, 1], [], []>} : vector<64x64xf32>, vector<64x128xf32>, vector<64x128xf32> -> vector<64x128xf32>
    %c0_9 = arith.constant 0 : index
    %c0_10 = arith.constant 0 : index
    %9 = vector.load %arg4[%c0_9, %c0_10] : memref<64x128xf32, #tpu.memory_space<vmem>>, vector<64x128xf32>
    %cst_11 = arith.constant dense<0.000000e+00> : vector<64x128xf32>
    %10 = tpu.matmul %5, %9, %cst_11 {dimension_numbers = #tpu.dot_dimension_numbers<[1], [0], [0], [1], [0, 0, 1, 1], [], []>} : vector<64x64xf32>, vector<64x128xf32>, vector<64x128xf32> -> vector<64x128xf32>
    %11 = arith.addf %8, %10 : vector<64x128xf32>
    %c0_12 = arith.constant 0 : index
    %c0_13 = arith.constant 0 : index
    %12 = vector.load %arg5[%c0_12, %c0_13] : memref<1x128xf32, #tpu.memory_space<vmem>>, vector<1x128xf32>
    %13 = vector.broadcast %12 : vector<1x128xf32> to vector<64x128xf32>
    %14 = arith.addf %11, %13 : vector<64x128xf32>
    %cst_14 = arith.constant 0.000000e+00 : f32
    %15 = vector.broadcast %cst_14 : f32 to vector<64x128xf32>
    %16 = arith.maximumf %14, %15 : vector<64x128xf32>
    %c0_15 = arith.constant 0 : index
    %c0_16 = arith.constant 0 : index
    %17 = vector.load %arg6[%c0_15, %c0_16] : memref<64x128xf32, #tpu.memory_space<vmem>>, vector<64x128xf32>
    tpu.vector_store %arg6[%c0_15, %c0_16], %16 {strides = array<i32>} : memref<64x128xf32, #tpu.memory_space<vmem>>, vector<64x128xf32>,
    return
  }
  func.func @transform_0(%arg0: i32) -> (i32, i32) {
    %c0_i32 = arith.constant 0 : i32
    %c0_i32_0 = arith.constant 0 : i32
    return %arg0, %c0_i32 : i32, i32
  }
  func.func @transform_1(%arg0: i32) -> (i32, i32, i32) {
    %c0_i32 = arith.constant 0 : i32
    %c0_i32_0 = arith.constant 0 : i32
    %c0_i32_1 = arith.constant 0 : i32
    return %arg0, %c0_i32, %c0_i32_0 : i32, i32, i32
  }
  func.func @transform_2(%arg0: i32) -> (i32, i32) {
    %c0_i32 = arith.constant 0 : i32
    %c0_i32_0 = arith.constant 0 : i32
    %c0_i32_1 = arith.constant 0 : i32
    return %c0_i32, %c0_i32_0 : i32, i32
  }
  func.func @transform_3(%arg0: i32) -> (i32, i32) {
    %c0_i32 = arith.constant 0 : i32
    %c0_i32_0 = arith.constant 0 : i32
    %c0_i32_1 = arith.constant 0 : i32
    return %c0_i32, %c0_i32_0 : i32, i32
  }
  func.func @transform_4(%arg0: i32) -> (i32, i32) {
    %c0_i32 = arith.constant 0 : i32
    %c0_i32_0 = arith.constant 0 : i32
    %c0_i32_1 = arith.constant 0 : i32
    return %c0_i32, %c0_i32_0 : i32, i32
  }
  func.func @transform_5(%arg0: i32) -> (i32, i32) {
    %c0_i32 = arith.constant 0 : i32
    %c0_i32_0 = arith.constant 0 : i32
    return %arg0, %c0_i32 : i32, i32
  }
}

</mosaic_0001>

<bundles_post_ra>
// kernel: tpu_custom_call.1
= control target key start
LH: loop header
LB: loop body
LE: loop exit
PB: predicated region body
PF: predicated region fallthrough
CT: control target
= control target key end

     0   :  { %10 = vsyncpa [#allocation3], 0  ;;  %s2422_s0 = inlined_call_operand.vmem [shape: f32[128,64], index: 0, kind: input, shape index: {}]   ;;  %s2423_s1 = inlined_call_operand.vmem [shape: f32[128,16,64], index: 1, kind: input, shape index: {}]   ;;  %s2424_s2 = inlined_call_operand.vmem [shape: f32[64,128], index: 2, kind: input, shape index: {}]   ;;  %s2425_s3 = inlined_call_operand.vmem [shape: f32[64,128], index: 3, kind: input, shape index: {}]   ;;  %s2426_s4 = inlined_call_operand.vmem [shape: f32[1,128], index: 4, kind: input, shape index: {}]   ;;  %s2427_s5 = inlined_call_operand.hbm [shape: f32[128,128], index: 5, kind: output, shape index: {}]  }
   0x1   :  { %12 = vsyncpa [#allocation3 + $0x1], 0  ;;  %s1904_s18 = smov 0   ;;  %s1906_s19 = smov 0  }
   0x2   :  { %s1908_s20 = smov 0   ;;  %s1910_s21 = smov 0  }
   0x3 LB: > { %s1925_s22 = sadd.s32 4294967295, %s1869_s21   ;;  %s1604_s23 = sadd.s32 4294967294, %s1869_s21   ;;  %s1869_s21 = sphi %s1910_s21, %s2434_s21   ;;  %s1865_s20 = sphi %s1908_s20, %s2433_s20   ;;  %s1861_s19 = sphi %s1906_s19, %s2432_s19   ;;  %s1857_s18 = sphi %s1904_s18, %s2431_s18  }
   0x4   : > { %s1929_s24 = sadd.s32 1, %s1869_s21   ;;  %s140_s25 = sadd.s32 1, %s1865_s20 }
   0x5   : > { %s137_s26 = ssub.s32 %s1869_s21, %s1929_s24  ;;  %p150_p0 = scmp.ne.s32.totalorder %s1865_s20, %s1861_s19 }
   0x6   : > { %p138_p1 = scmp.eq.s32.totalorder %s137_s26, 0  ;;  %p151_p2 = scmp.eq.s32.totalorder %s1925_s22, 1 }
   0x7   : > { %p156_p3 = scmp.ne.s32.totalorder %s1861_s19, %s1857_s18  ;;  %p157_p4 = scmp.eq.s32.totalorder %s1604_s23, 1 }
   0x8   : > { %s1940_s27 = scalar_select %p138_p1, %s1865_s20, %s140_s25  }
   0x9   : > { %p1942_p5 = por %p151_p2, %p150_p0  ;;  %p1946_p6 = por %p157_p4, %p156_p3 }
   0xa   : > { %p1607_p7 = scmp.ge.s32.totalorder %s1869_s21, 1  ;;  %p203_p8 = scmp.lt.s32.totalorder %s1869_s21, 3 }
   0xc   : > { %p204_p9 = pnand %p1607_p7, %p203_p8 }
   0xd   : > { %v1092_v0 = vld [vmem:[%s2424_s2] sm:$0xff] (!%p204_p9)  ;;  %v1093_v1 = vld [vmem:[%s2424_s2 + $0x8] sm:$0xff] (!%p204_p9)  ;;  %s1609_s11 = sshll.u32 (!%p204_p9), %s1925_s22, 3  ;;  %s1611_s12 = sshll.u32 (!%p204_p9), %s1925_s22, 6  ;;  %v1094_v5 = vld [vmem:[%s2424_s2 + $0x10] sm:$0xff] (!%p204_p9)  ;;  %vm379_vm0 = vcmask (!%p204_p9), 523264  }
   0xe   : > { %207 = sbr.rel (%p204_p9) target bundleno = 455 (0x1c7), region = 40  ;;  %v1100_v2 = vld [vmem:[%s2425_s3] sm:$0xff] (!%p204_p9)  ;;  %v1742_v3 = vpack.c.bf16 (!%p204_p9), %v1093_v1, %v1092_v0  ;;  %v1101_v4 = vld [vmem:[%s2425_s3 + $0x8] sm:$0xff] (!%p204_p9)  ;;  %v1095_v6 = vld [vmem:[%s2424_s2 + $0x18] sm:$0xff] (!%p204_p9)  ;;  %p238_p10 = scmp.lt.s32.totalorder (!%p204_p9), %s1609_s11, 15  ;;  %vm1172_vm1 = vcmask (!%p204_p9), 1041409  }
   0xf   : > { %p1972_p11 = scmp.lt.s32.totalorder (!%p204_p9), %s1611_s12, 127  ;;  %v1726_v7 = vpack.c.bf16 (!%p204_p9), %v1101_v4, %v1100_v2  ;;  %v1746_v8 = vpack.c.bf16 (!%p204_p9), %v1095_v6, %v1094_v5  ;;  %v1102_v9 = vld [vmem:[%s2425_s3 + $0x10] sm:$0xff] (!%p204_p9)  ;;  %v1103_v10 = vld [vmem:[%s2425_s3 + $0x18] sm:$0xff] (!%p204_p9)  ;;  %v1096_v11 = vld [vmem:[%s2424_s2 + $0x20] sm:$0xff] (!%p204_p9)  ;;  %vm1174_vm2 = vcmask (!%p204_p9), 1042434   ;;  %vm1176_vm3 = vcmask (!%p204_p9), 1043459  }
  0x10   : > { %1743 = vmatprep.subr.bf16.mxu0 (!%p204_p9), %v1742_v3  ;;  %v1730_v12 = vpack.c.bf16 (!%p204_p9), %v1103_v10, %v1102_v9  ;;  %v1097_v13 = vld [vmem:[%s2424_s2 + $0x28] sm:$0xff] (!%p204_p9)  ;;  %v1104_v14 = vld [vmem:[%s2425_s3 + $0x20] sm:$0xff] (!%p204_p9)  ;;  %v1098_v17 = vld [vmem:[%s2424_s2 + $0x30] sm:$0xff] (!%p204_p9)  ;;  %vm1178_vm4 = vcmask (!%p204_p9), 1044484   ;;  %vm1180_vm5 = vcmask (!%p204_p9), 1045509   ;;  %vm1182_vm6 = vcmask (!%p204_p9), 1046534  }
  0x11   : > { %v1105_v15 = vld [vmem:[%s2425_s3 + $0x28] sm:$0xff] (!%p204_p9)  ;;  %1727 = vmatprep.subr.bf16.mxu1 (!%p204_p9), %v1726_v7  ;;  %1745 = vmatpush3.bf16.msra.mxu0 (!%p204_p9), %v1742_v3  ;;  %v1750_v16 = vpack.c.bf16 (!%p204_p9), %v1097_v13, %v1096_v11  ;;  %v1099_v18 = vld [vmem:[%s2424_s2 + $0x38] sm:$0xff] (!%p204_p9)  ;;  %v1106_v20 = vld [vmem:[%s2425_s3 + $0x30] sm:$0xff] (!%p204_p9)  ;;  %vm1184_vm10 = vcmask (!%p204_p9), 1047559   ;;  %s1637_s8 = sshll.u32 (!%p204_p9), %s1925_s22, 10 }
  0x12   : > { %1729 = vmatpush3.bf16.msra.mxu1 (!%p204_p9), %v1726_v7  ;;  %1747 = vmatprep.subr.bf16.mxu0 (!%p204_p9), %v1746_v8  ;;  %v1734_v19 = vpack.c.bf16 (!%p204_p9), %v1105_v15, %v1104_v14  ;;  %v1107_v21 = vld [vmem:[%s2425_s3 + $0x38] sm:$0xff] (!%p204_p9)  ;;  %v1754_v23 = vpack.c.bf16 (!%p204_p9), %v1099_v18, %v1098_v17  ;;  %s2373_s13 = scalar_lea.hbm (!%p204_p9), %s2427_s5, %s1637_s8 }
  0x13   : > { %1731 = vmatprep.subr.bf16.mxu1 (!%p204_p9), %v1730_v12  ;;  %v1738_v27 = vpack.c.bf16 (!%p204_p9), %v1107_v21, %v1106_v20 }
  0x15   : > { %s2436_s11 = smov (!%p238_p10, %s1609_s11), 15  ;;  %s2438_s12 = smov (!%p1972_p11, %s1611_s12), 127  ;;  %1749 = vmatpush3.bf16.msra.mxu0 %v1746_v8 }
  0x16   : > { %s1610_s7 = sshll.u32 %s2436_s11, 3  ;;  %s1636_s16 = sshll.u32 %s2438_s12, 4  ;;  %1733 = vmatpush3.bf16.msra.mxu1 %v1730_v12  ;;  %1751 = vmatprep.subr.bf16.mxu0 %v1750_v16 }
  0x17   : > { %s2011_s15 = scalar_lea.vmem %s2422_s0, %s1610_s7  ;;  %s2017_s23 = scalar_lea.vmem %s2423_s1, %s1636_s16  ;;  %1735 = vmatprep.subr.bf16.mxu1 %v1734_v19 }
  0x18   : > { %v1084_v22 = vld [vmem:[%s2011_s15] sm:$0xff]  ;;  %v252_v25 = vld [vmem:[%s2017_s23 + $0x8] sm:$0xff]  ;;  %v253_v26 = vld [vmem:[%s2017_s23 + $0x10] sm:$0xff]  ;;  %s234_s12 = sand.u32 1, %s1861_s19  }
  0x19   : > { %1714 = vmatprep.mubr.msk.f32.mxu0 %vm379_vm0, %v1084_v22  ;;  %v251_v24 = vld [vmem:[%s2017_s23] sm:$0xff]  ;;  %v254_v28 = vld [vmem:[%s2017_s23 + $0x18] sm:$0xff]  ;;  %v256_v30 = vld [vmem:[%s2017_s23 + $0x28] sm:$0xff]  ;;  %v381_v32 = vsel %vm379_vm0, %v252_v25, -inf  ;;  %v389_v33 = vsel %vm379_vm0, %v253_v26, -inf  ;;  %1753 = vmatpush3.bf16.msra.mxu0 %v1750_v16  ;;  %s1608_s6 = sshll.u32 %s234_s12, 6 }
  0x1a   : > { %v255_v29 = vld [vmem:[%s2017_s23 + $0x20] sm:$0xff]  ;;  %v380_v31 = vsel %vm379_vm0, %v251_v24, -inf  ;;  %v257_v34 = vld [vmem:[%s2017_s23 + $0x30] sm:$0xff]  ;;  %v258_v35 = vld [vmem:[%s2017_s23 + $0x38] sm:$0xff]  ;;  %v390_v38 = vsel %vm379_vm0, %v254_v28, -inf  ;;  %v399_v40 = vsel %vm379_vm0, %v256_v30, -inf  ;;  %1737 = vmatpush3.bf16.msra.mxu1 %v1734_v19  ;;  %1755 = vmatprep.subr.bf16.mxu0 %v1754_v23 }
  0x1b   : > { %v259_v36 = vld [vmem:[%s2017_s23 + $0x40] sm:$0xff]  ;;  %v382_v37 = vmax.f32 %v380_v31, %v381_v32  ;;  %v398_v39 = vsel %vm379_vm0, %v255_v29, -inf  ;;  %v260_v41 = vld [vmem:[%s2017_s23 + $0x48] sm:$0xff]  ;;  %v261_v42 = vld [vmem:[%s2017_s23 + $0x50] sm:$0xff]  ;;  %v391_v44 = vmax.f32 %v389_v33, %v390_v38  ;;  %v407_v46 = vsel %vm379_vm0, %v257_v34, -inf  ;;  %1739 = vmatprep.subr.bf16.mxu1 %v1738_v27  ;;  %s2360_s7 = scalar_lea.vmem [#allocation2], %s1608_s6 }
  0x1c   : > { %v262_v43 = vld [vmem:[%s2017_s23 + $0x58] sm:$0xff]  ;;  %v400_v45 = vmax.f32 %v398_v39, %v399_v40  ;;  %v408_v47 = vsel %vm379_vm0, %v258_v35, -inf  ;;  %v263_v48 = vld [vmem:[%s2017_s23 + $0x60] sm:$0xff]  ;;  %v416_v51 = vsel %vm379_vm0, %v259_v36, -inf  ;;  %v417_v52 = vsel %vm379_vm0, %v260_v41, -inf  ;;  %v264_v53 = vld [vmem:[%s2017_s23 + $0x68] sm:$0xff] }
  0x1d   : > { %v383_v49 = vrot.slane %v382_v37, 4  ;;  %v409_v50 = vmax.f32 %v407_v46, %v408_v47  ;;  %v265_v54 = vld [vmem:[%s2017_s23 + $0x70] sm:$0xff]  ;;  %v392_v55 = vrot.slane %v391_v44, 4  ;;  %v418_v57 = vmax.f32 %v416_v51, %v417_v52  ;;  %v266_v63 = vld [vmem:[%s2017_s23 + $0x78] sm:$0xff]  ;;  %1757 = vmatpush3.bf16.msra.mxu0 %v1754_v23  ;;  %v1085_v8 = vld [vmem:[%s2011_s15 + $0x8] sm:$0xff]  ;;  %s1530_s9 = sshll.u32 %s2360_s7, 4  ;;  %s2375_s9 = int_to_ptr.vmem [resolvable:$true] %s1530_s9 }
  0x1e   : > { %v401_v56 = vrot.slane %v400_v45, 4  ;;  %v425_v58 = vsel %vm379_vm0, %v261_v42, -inf  ;;  %v426_v61 = vsel %vm379_vm0, %v262_v43, -inf  ;;  %v434_v62 = vsel %vm379_vm0, %v263_v48, -inf  ;;  %1741 = vmatpush3.bf16.msra.mxu1 %v1738_v27  ;;  %v1086_v13 = vld [vmem:[%s2011_s15 + $0x10] sm:$0xff]  ;;  %v1087_v41 = vld [vmem:[%s2011_s15 + $0x18] sm:$0xff] }
  0x1f   : > { %v384_v59 = vmax.f32 %v382_v37, %v383_v49  ;;  %v410_v60 = vrot.slane %v409_v50, 4  ;;  %v393_v0 = vmax.f32 %v391_v44, %v392_v55  ;;  %v419_v2 = vrot.slane %v418_v57, 4  ;;  %v267_v47 = vld [vmem:[%s2017_s23 + $0x80] sm:$0xff]  ;;  %v268_v48 = vld [vmem:[%s2017_s23 + $0x88] sm:$0xff]  ;;  %s2381_s14 = scalar_lea.sflag [#allocation3], %s234_s12  ;;  %s1807_s22 = scalar_lea.vmem %s2375_s9, 1024 }
  0x20   : > { %v402_v1 = vmax.f32 %v400_v45, %v401_v56  ;;  %v427_v3 = vmax.f32 %v425_v58, %v426_v61  ;;  %v435_v6 = vsel %vm379_vm0, %v264_v53, -inf  ;;  %v443_v7 = vsel %vm379_vm0, %v265_v54, -inf  ;;  %1715 = vmatmul.mubr.msk.f32.vlgmr.msra.gmra.mrb[0].mxu0 %vm379_vm0, %v1085_v8  ;;  %v269_v56 = vld [vmem:[%s2017_s23 + $0x90] sm:$0xff]  ;;  %v1088_v61 = vld [vmem:[%s2011_s15 + $0x20] sm:$0xff]  ;;  %p1808_p12 = scmp.ne.s32.totalorder %s2375_s9, %s1807_s22 }
  0x21   : > { %v385_v4 = vrot.slane %v384_v59, 2  ;;  %v411_v5 = vmax.f32 %v409_v50, %v410_v60  ;;  %v394_v9 = vrot.slane %v393_v0, 2  ;;  %v420_v11 = vmax.f32 %v418_v57, %v419_v2  ;;  %1717 = vmatprep.mubr.msk.f32.mxu0 %vm379_vm0, %v1086_v13  ;;  %v270_v57 = vld [vmem:[%s2017_s23 + $0x98] sm:$0xff]  ;;  %v271_v2 = vld [vmem:[%s2017_s23 + $0xa0] sm:$0xff] }
  0x22   : > { %v403_v10 = vrot.slane %v402_v1, 2  ;;  %v428_v12 = vrot.slane %v427_v3, 4  ;;  %v436_v16 = vmax.f32 %v434_v62, %v435_v6  ;;  %v444_v17 = vsel %vm379_vm0, %v266_v63, -inf  ;;  %p1809_p13 = pnand %p1808_p12, %p1942_p5 }
  0x23   : > { %v386_v14 = vmax.f32 %v384_v59, %v385_v4  ;;  %v412_v15 = vrot.slane %v411_v5, 2  ;;  %v395_v18 = vmax.f32 %v393_v0, %v394_v9  ;;  %v421_v20 = vrot.slane %v420_v11, 2  ;;  %v272_v4 = vld [vmem:[%s2017_s23 + $0xa8] sm:$0xff] }
  0x24   : > { %v404_v19 = vmax.f32 %v402_v1, %v403_v10  ;;  %v429_v21 = vmax.f32 %v427_v3, %v428_v12  ;;  %v437_v24 = vrot.slane %v436_v16, 4  ;;  %v445_v25 = vmax.f32 %v443_v7, %v444_v17  ;;  %1718 = vmatmul.mubr.msk.f32.gmra.mrb[2].mxu0 %vm379_vm0, %v1087_v41  ;;  %v273_v10 = vld [vmem:[%s2017_s23 + $0xb0] sm:$0xff]  ;;  %p1810_p0 = pneg %p1809_p13 }
  0x25   : > { %v387_v22 = vrot.slane %v386_v14, 1  ;;  %v413_v23 = vmax.f32 %v411_v5, %v412_v15  ;;  %v396_v26 = vrot.slane %v395_v18, 1  ;;  %v422_v28 = vmax.f32 %v420_v11, %v421_v20  ;;  %1720 = vmatprep.mubr.msk.f32.mxu0 %vm379_vm0, %v1088_v61  ;;  %v275_v15 = vld [vmem:[%s2017_s23 + $0xc0] sm:$0xff] }
  0x26   : > { %v405_v27 = vrot.slane %v404_v19, 1  ;;  %v430_v29 = vrot.slane %v429_v21, 2  ;;  %v438_v32 = vmax.f32 %v436_v16, %v437_v24  ;;  %v446_v33 = vrot.slane %v445_v25, 4  ;;  %v278_v24 = vld [vmem:[%s2017_s23 + $0xd8] sm:$0xff] }
  0x27   : > { %v388_v30 = vmax.f32 %v386_v14, %v387_v22  ;;  %v414_v31 = vrot.slane %v413_v23, 1  ;;  %v397_v34 = vmax.f32 %v395_v18, %v396_v26  ;;  %v423_v36 = vrot.slane %v422_v28, 1  ;;  %v274_v14 = vld [vmem:[%s2017_s23 + $0xb8] sm:$0xff] }
  0x28   : > { %v406_v35 = vmax.f32 %v404_v19, %v405_v27  ;;  %v431_v37 = vmax.f32 %v429_v21, %v430_v29  ;;  %v439_v39 = vrot.slane %v438_v32, 2  ;;  %v447_v40 = vmax.f32 %v445_v25, %v446_v33  ;;  %v276_v19 = vld [vmem:[%s2017_s23 + $0xc8] sm:$0xff]  ;;  %v279_v33 = vld [vmem:[%s2017_s23 + $0xe0] sm:$0xff] }
  0x29   : > { %v415_v38 = vmax.f32 %v413_v23, %v414_v31  ;;  %vm956_vm7 = vcmp.lt.f32.partialorder %v388_v30, -10000.0  ;;  %v424_v42 = vmax.f32 %v422_v28, %v423_v36  ;;  %vm957_vm8 = vcmp.lt.f32.partialorder %v397_v34, -10000.0  ;;  %v277_v23 = vld [vmem:[%s2017_s23 + $0xd0] sm:$0xff]  ;;  %v1089_v28 = vld [vmem:[%s2011_s15 + $0x28] sm:$0xff] }
  0x2a   : > { %v432_v43 = vrot.slane %v431_v37, 1  ;;  %vm958_vm9 = vcmp.lt.f32.partialorder %v406_v35, -10000.0  ;;  %v440_v44 = vmax.f32 %v438_v32, %v439_v39  ;;  %v448_v45 = vrot.slane %v447_v40, 2  ;;  %1721 = vmatmul.mubr.msk.f32.gmra.mrb[4].mxu0 %vm379_vm0, %v1089_v28 }
  0x2b   : > { %vm959_vm11 = vcmp.lt.f32.partialorder %v415_v38, -10000.0  ;;  %v1020_v46 = vsel %vm956_vm7, 0.0, %v388_v30  ;;  %vm960_vm12 = vcmp.lt.f32.partialorder %v424_v42, -10000.0  ;;  %v1021_v50 = vsel %vm957_vm8, 0.0, %v397_v34  ;;  %v280_v34 = vld [vmem:[%s2017_s23 + $0xe8] sm:$0xff] }
  0x2c   : > { %v433_v49 = vmax.f32 %v431_v37, %v432_v43  ;;  %v1022_v51 = vsel %vm958_vm9, 0.0, %v406_v35  ;;  %v441_v52 = vrot.slane %v440_v44, 1  ;;  %v449_v53 = vmax.f32 %v447_v40, %v448_v45  ;;  %v281_v43 = vld [vmem:[%s2017_s23 + $0xf0] sm:$0xff] }
  0x2d   : > { %v1023_v54 = vsel %vm959_vm11, 0.0, %v415_v38  ;;  %v1024_v55 = vsel %vm960_vm12, 0.0, %v424_v42  ;;  %v1173_v58 = vsel %vm1172_vm1, %v1021_v50, %v1020_v46  ;;  %v452_v59 = vsel %vm379_vm0, %v267_v47, -inf }
  0x2e   : > { %vm961_vm13 = vcmp.lt.f32.partialorder %v433_v49, -10000.0  ;;  %v453_v60 = vsel %vm379_vm0, %v268_v48, -inf  ;;  %v442_v62 = vmax.f32 %v440_v44, %v441_v52  ;;  %v450_v63 = vrot.slane %v449_v53, 1  ;;  %v282_v52 = vld [vmem:[%s2017_s23 + $0xf8] sm:$0xff] }
  0x2f   : > { %v1025_v0 = vsel %vm961_vm13, 0.0, %v433_v49  ;;  %v1175_v1 = vsel %vm1174_vm2, %v1022_v51, %v1173_v58  ;;  %v454_v5 = vmax.f32 %v452_v59, %v453_v60  ;;  %v461_v6 = vsel %vm379_vm0, %v269_v56, -inf }
  0x30   : > { %v1177_v3 = vsel %vm1176_vm3, %v1023_v54, %v1175_v1  ;;  %v462_v7 = vsel %vm379_vm0, %v270_v57, -inf  ;;  %v451_v8 = vmax.f32 %v449_v53, %v450_v63  ;;  %vm962_vm14 = vcmp.lt.f32.partialorder %v442_v62, -10000.0  ;;  %v1090_v57 = vld [vmem:[%s2011_s15 + $0x30] sm:$0xff] }
  0x31   : > { %v1179_v9 = vsel %vm1178_vm4, %v1024_v55, %v1177_v3  ;;  %v463_v11 = vmax.f32 %v461_v6, %v462_v7  ;;  %v1026_v12 = vsel %vm962_vm14, 0.0, %v442_v62  ;;  %v455_v16 = vrot.slane %v454_v5, 4  ;;  %1723 = vmatprep.mubr.msk.f32.mxu0 %vm379_vm0, %v1090_v57 }
  0x32   : > { %v1181_v13 = vsel %vm1180_vm5, %v1025_v0, %v1179_v9  ;;  %v470_v17 = vsel %vm379_vm0, %v271_v2, -inf  ;;  %vm963_vm15 = vcmp.lt.f32.partialorder %v451_v8, -10000.0  ;;  %v471_v21 = vsel %vm379_vm0, %v272_v4, -inf }
  0x33   : > { %v1183_v18 = vsel %vm1182_vm6, %v1026_v12, %v1181_v13  ;;  %v464_v20 = vrot.slane %v463_v11, 4  ;;  %v1027_v22 = vsel %vm963_vm15, 0.0, %v451_v8  ;;  %v456_v25 = vmax.f32 %v454_v5, %v455_v16 }
  0x34   : > { %v472_v26 = vmax.f32 %v470_v17, %v471_v21  ;;  %v479_v27 = vsel %vm379_vm0, %v273_v10, -inf  ;;  %v1185_v29 = vsel %vm1184_vm10, %v1027_v22, %v1183_v18  ;;  %v480_v31 = vsel %vm379_vm0, %v274_v14, -inf }
  0x35   : > { %v465_v30 = vmax.f32 %v463_v11, %v464_v20  ;;  %v488_v32 = vsel %vm379_vm0, %v275_v15, -inf  ;;  %1686 = vmatprep.mubr.msk.f32.mxu1 %vm379_vm0, %v1185_v29  ;;  %v457_v35 = vrot.slane %v456_v25, 2  ;;  %v481_v37 = vmax.f32 %v479_v27, %v480_v31  ;;  %v284_v31 = vld [vmem:[%s2017_s23 + $0x108] sm:$0xff] }
  0x36   : > { %v473_v36 = vrot.slane %v472_v26, 4  ;;  %v489_v38 = vsel %vm379_vm0, %v276_v19, -inf  ;;  %v497_v41 = vsel %vm379_vm0, %v277_v23, -inf  ;;  %v498_v42 = vsel %vm379_vm0, %v278_v24, -inf  ;;  %v283_v23 = vld [vmem:[%s2017_s23 + $0x100] sm:$0xff] }
  0x37   : > { %v466_v39 = vrot.slane %v465_v30, 2  ;;  %v490_v40 = vmax.f32 %v488_v32, %v489_v38  ;;  %v458_v44 = vmax.f32 %v456_v25, %v457_v35  ;;  %v482_v46 = vrot.slane %v481_v37, 4 }
  0x38   : > { %v474_v45 = vmax.f32 %v472_v26, %v473_v36  ;;  %v499_v47 = vmax.f32 %v497_v41, %v498_v42  ;;  %v506_v50 = vsel %vm379_vm0, %v279_v33, -inf  ;;  %v507_v51 = vsel %vm379_vm0, %v280_v34, -inf  ;;  %v285_v34 = vld [vmem:[%s2017_s23 + $0x110] sm:$0xff]  ;;  %v1091_v36 = vld [vmem:[%s2011_s15 + $0x38] sm:$0xff]  ;;  %v287_v41 = vld [vmem:[%s2017_s23 + $0x120] sm:$0xff]  ;;  %s1871_s15 = smov [#allocation2]  }
  0x39   : > { %v467_v48 = vmax.f32 %v465_v30, %v466_v39  ;;  %v491_v49 = vrot.slane %v490_v40, 4  ;;  %v459_v53 = vrot.slane %v458_v44, 1  ;;  %v483_v55 = vmax.f32 %v481_v37, %v482_v46  ;;  %v288_v42 = vld [vmem:[%s2017_s23 + $0x128] sm:$0xff]  ;;  %1724 = vmatmul.mubr.msk.f32.gmra.mrb[6].mxu0 %vm379_vm0, %v1091_v36  ;;  %s1811_s16 = sshll.u32 %s1871_s15, 4  ;;  %s1812_s16 = int_to_ptr.vmem [resolvable:$false] %s1811_s16 }
  0x3a   : > { %v475_v54 = vrot.slane %v474_v45, 2  ;;  %v500_v56 = vrot.slane %v499_v47, 4  ;;  %v508_v60 = vmax.f32 %v506_v50, %v507_v51  ;;  %v515_v61 = vsel %vm379_vm0, %v281_v43, -inf  ;;  %v290_v50 = vld [vmem:[%s2017_s23 + $0x138] sm:$0xff]  ;;  %s1813_s11 = scalar_lea.vmem %s1812_s16, 2048  ;;  %p1814_p1 = scmp.lt.s32.totalorder %s2375_s9, %s1812_s16 }
  0x3b   : > { %v468_v58 = vrot.slane %v467_v48, 1  ;;  %v492_v59 = vmax.f32 %v490_v40, %v491_v49  ;;  %v460_v62 = vmax.f32 %v458_v44, %v459_v53  ;;  %v484_v0 = vrot.slane %v483_v55, 2  ;;  %v286_v40 = vld [vmem:[%s2017_s23 + $0x118] sm:$0xff]  ;;  %v289_v49 = vld [vmem:[%s2017_s23 + $0x130] sm:$0xff]  ;;  %p1815_p2 = scmp.lt.s32.totalorder %s1813_s11, %s1807_s22 }
  0x3c   : > { %v476_v63 = vmax.f32 %v474_v45, %v475_v54  ;;  %v501_v1 = vmax.f32 %v499_v47, %v500_v56  ;;  %v509_v4 = vrot.slane %v508_v60, 4  ;;  %v516_v5 = vsel %vm379_vm0, %v282_v52, -inf }
  0x3d   : > { %v469_v2 = vmax.f32 %v467_v48, %v468_v58  ;;  %v493_v3 = vrot.slane %v492_v59, 2  ;;  %v485_v7 = vmax.f32 %v483_v55, %v484_v0  ;;  %v517_v9 = vmax.f32 %v515_v61, %v516_v5  ;;  %v291_v58 = vld [vmem:[%s2017_s23 + $0x140] sm:$0xff]  ;;  %p1816_p3 = por %p1815_p2, %p1814_p1 }
  0x3e   : > { %v477_v6 = vrot.slane %v476_v63, 1  ;;  %v502_v8 = vrot.slane %v501_v1, 2  ;;  %v510_v11 = vmax.f32 %v508_v60, %v509_v4  ;;  %vm964_vm7 = vcmp.lt.f32.partialorder %v460_v62, -10000.0 }
  0x3f   : > { %v494_v10 = vmax.f32 %v492_v59, %v493_v3  ;;  %vm965_vm8 = vcmp.lt.f32.partialorder %v469_v2, -10000.0  ;;  %v486_v13 = vrot.slane %v485_v7, 1  ;;  %v518_v15 = vrot.slane %v517_v9, 4  ;;  %v292_v59 = vld [vmem:[%s2017_s23 + $0x148] sm:$0xff]  ;;  %v294_v3 = vld [vmem:[%s2017_s23 + $0x158] sm:$0xff]  ;;  %p1817_p4 = pnand %p1816_p3, %p1810_p0 }
  0x40   : > { %v478_v12 = vmax.f32 %v476_v63, %v477_v6  ;;  %v503_v14 = vmax.f32 %v501_v1, %v502_v8  ;;  %v511_v17 = vrot.slane %v510_v11, 2  ;;  %v1028_v18 = vsel %vm964_vm7, 0.0, %v460_v62 }
  0x41   : > { %v495_v16 = vrot.slane %v494_v10, 1  ;;  %v1029_v19 = vsel %vm965_vm8, 0.0, %v469_v2  ;;  %v487_v20 = vmax.f32 %v485_v7, %v486_v13  ;;  %v519_v22 = vmax.f32 %v517_v9, %v518_v15  ;;  %v293_v2 = vld [vmem:[%s2017_s23 + $0x150] sm:$0xff]  ;;  %v296_v13 = vld [vmem:[%s2017_s23 + $0x168] sm:$0xff] }
  0x42   : > { %v504_v21 = vrot.slane %v503_v14, 1  ;;  %vm966_vm9 = vcmp.lt.f32.partialorder %v478_v12, -10000.0  ;;  %v512_v25 = vmax.f32 %v510_v11, %v511_v17  ;;  %v1186_v27 = vsel %vm1172_vm1, %v1029_v19, %v1028_v18 }
  0x43   : > { %v496_v24 = vmax.f32 %v494_v10, %v495_v16  ;;  %v1030_v26 = vsel %vm966_vm9, 0.0, %v478_v12  ;;  %v520_v29 = vrot.slane %v519_v22, 2  ;;  %vm967_vm11 = vcmp.lt.f32.partialorder %v487_v20, -10000.0  ;;  %v295_v12 = vld [vmem:[%s2017_s23 + $0x160] sm:$0xff] }
  0x44   : > { %v505_v28 = vmax.f32 %v503_v14, %v504_v21  ;;  %v1187_v30 = vsel %vm1174_vm2, %v1030_v26, %v1186_v27  ;;  %v513_v32 = vrot.slane %v512_v25, 1  ;;  %v1031_v33 = vsel %vm967_vm11, 0.0, %v487_v20  ;;  %v297_v21 = vld [vmem:[%s2017_s23 + $0x170] sm:$0xff] }
  0x45   : > { %vm968_vm12 = vcmp.lt.f32.partialorder %v496_v24, -10000.0  ;;  %v524_v35 = vsel %vm379_vm0, %v283_v23, -inf  ;;  %v521_v37 = vmax.f32 %v519_v22, %v520_v29  ;;  %v1188_v39 = vsel %vm1176_vm3, %v1031_v33, %v1187_v30  ;;  %v298_v30 = vld [vmem:[%s2017_s23 + $0x178] sm:$0xff] }
  0x46   : > { %vm969_vm13 = vcmp.lt.f32.partialorder %v505_v28, -10000.0  ;;  %v1032_v38 = vsel %vm968_vm12, 0.0, %v496_v24  ;;  %v514_v43 = vmax.f32 %v512_v25, %v513_v32  ;;  %v525_v46 = vsel %vm379_vm0, %v284_v31, -inf }
  0x47   : > { %v1033_v44 = vsel %vm969_vm13, 0.0, %v505_v28  ;;  %v1189_v45 = vsel %vm1178_vm4, %v1032_v38, %v1188_v39  ;;  %v522_v47 = vrot.slane %v521_v37, 1  ;;  %v526_v51 = vmax.f32 %v524_v35, %v525_v46 }
  0x48   : > { %v1190_v48 = vsel %vm1180_vm5, %v1033_v44, %v1189_v45  ;;  %v533_v52 = vsel %vm379_vm0, %v285_v34, -inf  ;;  %vm970_vm14 = vcmp.lt.f32.partialorder %v514_v43, -10000.0  ;;  %v534_v53 = vsel %vm379_vm0, %v286_v40, -inf }
  0x49   : > { %v542_v54 = vsel %vm379_vm0, %v287_v41, -inf  ;;  %v543_v55 = vsel %vm379_vm0, %v288_v42, -inf  ;;  %v523_v56 = vmax.f32 %v521_v37, %v522_v47  ;;  %v1034_v57 = vsel %vm970_vm14, 0.0, %v514_v43 }
  0x4a   : > { %v527_v60 = vrot.slane %v526_v51, 4  ;;  %v535_v61 = vmax.f32 %v533_v52, %v534_v53  ;;  %v1191_v62 = vsel %vm1182_vm6, %v1034_v57, %v1190_v48  ;;  %v544_v63 = vmax.f32 %v542_v54, %v543_v55 }
  0x4b   : > { %v551_v0 = vsel %vm379_vm0, %v289_v49, -inf  ;;  %v552_v1 = vsel %vm379_vm0, %v290_v50, -inf  ;;  %vm971_vm15 = vcmp.lt.f32.partialorder %v523_v56, -10000.0  ;;  %v560_v9 = vsel %vm379_vm0, %v291_v58, -inf }
  0x4c   : > { %v528_v4 = vmax.f32 %v526_v51, %v527_v60  ;;  %v536_v5 = vrot.slane %v535_v61, 4  ;;  %v553_v6 = vmax.f32 %v551_v0, %v552_v1  ;;  %v1035_v7 = vsel %vm971_vm15, 0.0, %v523_v56  ;;  %v299_v60 = vld [vmem:[%s2017_s23 + $0x180] sm:$0xff]  ;;  %v300_v0 = vld [vmem:[%s2017_s23 + $0x188] sm:$0xff] }
  0x4d   : > { %v545_v8 = vrot.slane %v544_v63, 4  ;;  %v561_v10 = vsel %vm379_vm0, %v292_v59, -inf  ;;  %v1192_v11 = vsel %vm1184_vm10, %v1035_v7, %v1191_v62  ;;  %v569_v19 = vsel %vm379_vm0, %v293_v2, -inf }
  0x4e   : > { %v529_v14 = vrot.slane %v528_v4, 2  ;;  %v537_v15 = vmax.f32 %v535_v61, %v536_v5  ;;  %v554_v16 = vrot.slane %v553_v6, 4  ;;  %1687 = vmatmul.mubr.msk.f32.vlgmr.msra.gmra.mrb[0].mxu1 %vm379_vm0, %v1192_v11  ;;  %v562_v18 = vmax.f32 %v560_v9, %v561_v10  ;;  %v301_v11 = vld [vmem:[%s2017_s23 + $0x190] sm:$0xff] }
  0x4f   : > { %v546_v17 = vmax.f32 %v544_v63, %v545_v8  ;;  %v570_v20 = vsel %vm379_vm0, %v294_v3, -inf  ;;  %v578_v28 = vsel %vm379_vm0, %v295_v12, -inf  ;;  %v579_v29 = vsel %vm379_vm0, %v296_v13, -inf  ;;  %v302_v12 = vld [vmem:[%s2017_s23 + $0x198] sm:$0xff] }
  0x50   : > { %v530_v22 = vmax.f32 %v528_v4, %v529_v14  ;;  %v538_v23 = vrot.slane %v537_v15, 2  ;;  %v555_v24 = vmax.f32 %v553_v6, %v554_v16  ;;  %v571_v25 = vmax.f32 %v569_v19, %v570_v20 }
  0x51   : > { %v547_v26 = vrot.slane %v546_v17, 2  ;;  %v563_v27 = vrot.slane %v562_v18, 4  ;;  %v580_v37 = vmax.f32 %v578_v28, %v579_v29  ;;  %v587_v38 = vsel %vm379_vm0, %v297_v21, -inf  ;;  %v304_v21 = vld [vmem:[%s2017_s23 + $0x1a8] sm:$0xff]  ;;  %v306_v28 = vld [vmem:[%s2017_s23 + $0x1b8] sm:$0xff]  ;;  %v307_v29 = vld [vmem:[%s2017_s23 + $0x1c0] sm:$0xff] }
  0x52   : > { %v531_v31 = vrot.slane %v530_v22, 1  ;;  %v539_v32 = vmax.f32 %v537_v15, %v538_v23  ;;  %v556_v33 = vrot.slane %v555_v24, 2  ;;  %v572_v34 = vrot.slane %v571_v25, 4 }
  0x53   : > { %v548_v35 = vmax.f32 %v546_v17, %v547_v26  ;;  %v564_v36 = vmax.f32 %v562_v18, %v563_v27  ;;  %v581_v45 = vrot.slane %v580_v37, 4  ;;  %v588_v46 = vsel %vm379_vm0, %v298_v30, -inf  ;;  %v303_v17 = vld [vmem:[%s2017_s23 + $0x1a0] sm:$0xff]  ;;  %v308_v30 = vld [vmem:[%s2017_s23 + $0x1c8] sm:$0xff] }
  0x54   : > { %v532_v39 = vmax.f32 %v530_v22, %v531_v31  ;;  %v540_v40 = vrot.slane %v539_v32, 1  ;;  %v557_v41 = vmax.f32 %v555_v24, %v556_v33  ;;  %v573_v42 = vmax.f32 %v571_v25, %v572_v34  ;;  %v305_v22 = vld [vmem:[%s2017_s23 + $0x1b0] sm:$0xff] }
  0x55   : > { %v549_v43 = vrot.slane %v548_v35, 1  ;;  %v565_v44 = vrot.slane %v564_v36, 2  ;;  %v589_v50 = vmax.f32 %v587_v38, %v588_v46  ;;  %v582_v53 = vmax.f32 %v580_v37, %v581_v45 }
  0x56   : > { %v541_v47 = vmax.f32 %v539_v32, %v540_v40  ;;  %v558_v48 = vrot.slane %v557_v41, 1  ;;  %v574_v49 = vrot.slane %v573_v42, 2  ;;  %vm972_vm7 = vcmp.lt.f32.partialorder %v532_v39, -10000.0 }
  0x57   : > { %v550_v51 = vmax.f32 %v548_v35, %v549_v43  ;;  %v566_v52 = vmax.f32 %v564_v36, %v565_v44  ;;  %v590_v56 = vrot.slane %v589_v50, 4  ;;  %v583_v58 = vrot.slane %v582_v53, 2  ;;  %v310_v43 = vld [vmem:[%s2017_s23 + $0x1d8] sm:$0xff] }
  0x58   : > { %v559_v54 = vmax.f32 %v557_v41, %v558_v48  ;;  %v575_v55 = vmax.f32 %v573_v42, %v574_v49  ;;  %vm973_vm8 = vcmp.lt.f32.partialorder %v541_v47, -10000.0  ;;  %v1036_v59 = vsel %vm972_vm7, 0.0, %v532_v39  ;;  %v309_v39 = vld [vmem:[%s2017_s23 + $0x1d0] sm:$0xff]  ;;  %v311_v48 = vld [vmem:[%s2017_s23 + $0x1e0] sm:$0xff] }
  0x59   : > { %v567_v57 = vrot.slane %v566_v52, 1  ;;  %vm974_vm9 = vcmp.lt.f32.partialorder %v550_v51, -10000.0  ;;  %v591_v62 = vmax.f32 %v589_v50, %v590_v56  ;;  %v1037_v63 = vsel %vm973_vm8, 0.0, %v541_v47 }
  0x5a   : > { %v576_v61 = vrot.slane %v575_v55, 1  ;;  %vm975_vm11 = vcmp.lt.f32.partialorder %v559_v54, -10000.0  ;;  %v584_v2 = vmax.f32 %v582_v53, %v583_v58  ;;  %v1038_v3 = vsel %vm974_vm9, 0.0, %v550_v51  ;;  %v312_v53 = vld [vmem:[%s2017_s23 + $0x1e8] sm:$0xff] }
  0x5b   : > { %v568_v1 = vmax.f32 %v566_v52, %v567_v57  ;;  %v1039_v4 = vsel %vm975_vm11, 0.0, %v559_v54  ;;  %v592_v6 = vrot.slane %v591_v62, 2  ;;  %v1193_v7 = vsel %vm1172_vm1, %v1037_v63, %v1036_v59 }
  0x5c   : > { %v577_v5 = vmax.f32 %v575_v55, %v576_v61  ;;  %v596_v8 = vsel %vm379_vm0, %v299_v60, -inf  ;;  %v585_v9 = vrot.slane %v584_v2, 1  ;;  %v1194_v10 = vsel %vm1174_vm2, %v1038_v3, %v1193_v7  ;;  %v313_v61 = vld [vmem:[%s2017_s23 + $0x1f0] sm:$0xff] }
  0x5d   : > { %vm976_vm12 = vcmp.lt.f32.partialorder %v568_v1, -10000.0  ;;  %v597_v13 = vsel %vm379_vm0, %v300_v0, -inf  ;;  %v593_v14 = vmax.f32 %v591_v62, %v592_v6  ;;  %v1195_v16 = vsel %vm1176_vm3, %v1039_v4, %v1194_v10  ;;  %v314_v6 = vld [vmem:[%s2017_s23 + $0x1f8] sm:$0xff] }
  0x5e   : > { %vm977_vm13 = vcmp.lt.f32.partialorder %v577_v5, -10000.0  ;;  %v1040_v15 = vsel %vm976_vm12, 0.0, %v568_v1  ;;  %v586_v18 = vmax.f32 %v584_v2, %v585_v9  ;;  %v598_v23 = vmax.f32 %v596_v8, %v597_v13 }
  0x5f   : > { %v1041_v19 = vsel %vm977_vm13, 0.0, %v577_v5  ;;  %v1196_v20 = vsel %vm1178_vm4, %v1040_v15, %v1195_v16  ;;  %v594_v24 = vrot.slane %v593_v14, 1  ;;  %v605_v26 = vsel %vm379_vm0, %v301_v11, -inf }
  0x60   : > { %v1197_v25 = vsel %vm1180_vm5, %v1041_v19, %v1196_v20  ;;  %v606_v27 = vsel %vm379_vm0, %v302_v12, -inf  ;;  %vm978_vm14 = vcmp.lt.f32.partialorder %v586_v18, -10000.0  ;;  %v599_v31 = vrot.slane %v598_v23, 4 }
  0x61   : > { %v607_v32 = vmax.f32 %v605_v26, %v606_v27  ;;  %v614_v33 = vsel %vm379_vm0, %v303_v17, -inf  ;;  %v595_v34 = vmax.f32 %v593_v14, %v594_v24  ;;  %v1042_v35 = vsel %vm978_vm14, 0.0, %v586_v18  ;;  %v315_v26 = vld [vmem:[%s2017_s23 + $0x200] sm:$0xff] }
  0x62   : > { %v615_v36 = vsel %vm379_vm0, %v304_v21, -inf  ;;  %v623_v37 = vsel %vm379_vm0, %v305_v22, -inf  ;;  %v1198_v38 = vsel %vm1182_vm6, %v1042_v35, %v1197_v25  ;;  %v600_v40 = vmax.f32 %v598_v23, %v599_v31 }
  0x63   : > { %v608_v41 = vrot.slane %v607_v32, 4  ;;  %v616_v42 = vmax.f32 %v614_v33, %v615_v36  ;;  %vm979_vm15 = vcmp.lt.f32.partialorder %v595_v34, -10000.0  ;;  %v624_v44 = vsel %vm379_vm0, %v306_v28, -inf }
  0x64   : > { %v632_v45 = vsel %vm379_vm0, %v307_v29, -inf  ;;  %v633_v46 = vsel %vm379_vm0, %v308_v30, -inf  ;;  %v1043_v47 = vsel %vm979_vm15, 0.0, %v595_v34  ;;  %v601_v49 = vrot.slane %v600_v40, 2  ;;  %v316_v34 = vld [vmem:[%s2017_s23 + $0x208] sm:$0xff] }
  0x65   : > { %v609_v50 = vmax.f32 %v607_v32, %v608_v41  ;;  %v617_v51 = vrot.slane %v616_v42, 4  ;;  %v1199_v52 = vsel %vm1184_vm10, %v1043_v47, %v1198_v38  ;;  %v625_v54 = vmax.f32 %v623_v37, %v624_v44 }
  0x66   : > { %v634_v55 = vmax.f32 %v632_v45, %v633_v46  ;;  %v641_v56 = vsel %vm379_vm0, %v309_v39, -inf  ;;  %1689 = vmatprep.mubr.msk.f32.mxu1 %vm379_vm0, %v1199_v52  ;;  %v602_v57 = vmax.f32 %v600_v40, %v601_v49  ;;  %v642_v60 = vsel %vm379_vm0, %v310_v43, -inf }
  0x67   : > { %v610_v58 = vrot.slane %v609_v50, 2  ;;  %v618_v59 = vmax.f32 %v616_v42, %v617_v51  ;;  %v626_v62 = vrot.slane %v625_v54, 4  ;;  %v643_v0 = vmax.f32 %v641_v56, %v642_v60  ;;  %v319_v56 = vld [vmem:[%s2017_s23 + $0x220] sm:$0xff] }
  0x68   : > { %v635_v63 = vrot.slane %v634_v55, 4  ;;  %v650_v1 = vsel %vm379_vm0, %v311_v48, -inf  ;;  %v603_v2 = vrot.slane %v602_v57, 1  ;;  %v651_v5 = vsel %vm379_vm0, %v312_v53, -inf  ;;  %v317_v48 = vld [vmem:[%s2017_s23 + $0x210] sm:$0xff]  ;;  %v318_v53 = vld [vmem:[%s2017_s23 + $0x218] sm:$0xff] }
  0x69   : > { %v611_v3 = vmax.f32 %v609_v50, %v610_v58  ;;  %v619_v4 = vrot.slane %v618_v59, 2  ;;  %v627_v7 = vmax.f32 %v625_v54, %v626_v62  ;;  %v644_v9 = vrot.slane %v643_v0, 4  ;;  %v321_v62 = vld [vmem:[%s2017_s23 + $0x230] sm:$0xff] }
  0x6a   : > { %v636_v8 = vmax.f32 %v634_v55, %v635_v63  ;;  %v652_v10 = vmax.f32 %v650_v1, %v651_v5  ;;  %v604_v11 = vmax.f32 %v602_v57, %v603_v2  ;;  %v659_v14 = vsel %vm379_vm0, %v313_v61, -inf  ;;  %v320_v61 = vld [vmem:[%s2017_s23 + $0x228] sm:$0xff]  ;;  %v322_v1 = vld [vmem:[%s2017_s23 + $0x238] sm:$0xff] }
  0x6b   : > { %v612_v12 = vrot.slane %v611_v3, 1  ;;  %v620_v13 = vmax.f32 %v618_v59, %v619_v4  ;;  %v628_v15 = vrot.slane %v627_v7, 2  ;;  %v645_v17 = vmax.f32 %v643_v0, %v644_v9 }
  0x6c   : > { %v637_v16 = vrot.slane %v636_v8, 2  ;;  %v653_v18 = vrot.slane %v652_v10, 4  ;;  %v660_v21 = vsel %vm379_vm0, %v314_v6, -inf  ;;  %vm980_vm7 = vcmp.lt.f32.partialorder %v604_v11, -10000.0  ;;  %v323_v6 = vld [vmem:[%s2017_s23 + $0x240] sm:$0xff] }
  0x6d   : > { %v613_v19 = vmax.f32 %v611_v3, %v612_v12  ;;  %v621_v20 = vrot.slane %v620_v13, 1  ;;  %v629_v22 = vmax.f32 %v627_v7, %v628_v15  ;;  %v646_v24 = vrot.slane %v645_v17, 2  ;;  %v324_v7 = vld [vmem:[%s2017_s23 + $0x248] sm:$0xff]  ;;  %v325_v15 = vld [vmem:[%s2017_s23 + $0x250] sm:$0xff] }
  0x6e   : > { %v638_v23 = vmax.f32 %v636_v8, %v637_v16  ;;  %v654_v25 = vmax.f32 %v652_v10, %v653_v18  ;;  %v661_v28 = vmax.f32 %v659_v14, %v660_v21  ;;  %v1044_v29 = vsel %vm980_vm7, 0.0, %v604_v11 }
  0x6f   : > { %v622_v27 = vmax.f32 %v620_v13, %v621_v20  ;;  %vm981_vm8 = vcmp.lt.f32.partialorder %v613_v19, -10000.0  ;;  %v630_v30 = vrot.slane %v629_v22, 1  ;;  %v647_v32 = vmax.f32 %v645_v17, %v646_v24  ;;  %v327_v24 = vld [vmem:[%s2017_s23 + $0x260] sm:$0xff] }
  0x70   : > { %v639_v31 = vrot.slane %v638_v23, 1  ;;  %v655_v33 = vrot.slane %v654_v25, 2  ;;  %v662_v35 = vrot.slane %v661_v28, 4  ;;  %v1045_v36 = vsel %vm981_vm8, 0.0, %v613_v19 }
  0x71   : > { %vm982_vm9 = vcmp.lt.f32.partialorder %v622_v27, -10000.0  ;;  %v668_v37 = vsel %vm379_vm0, %v315_v26, -inf  ;;  %v631_v38 = vmax.f32 %v629_v22, %v630_v30  ;;  %v648_v40 = vrot.slane %v647_v32, 1 }
  0x72   : > { %v640_v39 = vmax.f32 %v638_v23, %v639_v31  ;;  %v656_v41 = vmax.f32 %v654_v25, %v655_v33  ;;  %v663_v42 = vmax.f32 %v661_v28, %v662_v35  ;;  %v1046_v43 = vsel %vm982_vm9, 0.0, %v622_v27  ;;  %v326_v23 = vld [vmem:[%s2017_s23 + $0x258] sm:$0xff]  ;;  %v328_v33 = vld [vmem:[%s2017_s23 + $0x268] sm:$0xff] }
  0x73   : > { %v1200_v44 = vsel %vm1172_vm1, %v1045_v36, %v1044_v29  ;;  %v669_v45 = vsel %vm379_vm0, %v316_v34, -inf  ;;  %v649_v46 = vmax.f32 %v647_v32, %v648_v40  ;;  %vm983_vm11 = vcmp.lt.f32.partialorder %v631_v38, -10000.0  ;;  %v329_v34 = vld [vmem:[%s2017_s23 + $0x270] sm:$0xff] }
  0x74   : > { %v657_v47 = vrot.slane %v656_v41, 1  ;;  %vm984_vm12 = vcmp.lt.f32.partialorder %v640_v39, -10000.0  ;;  %v664_v49 = vrot.slane %v663_v42, 2  ;;  %v1047_v50 = vsel %vm983_vm11, 0.0, %v631_v38 }
  0x75   : > { %v1048_v51 = vsel %vm984_vm12, 0.0, %v640_v39  ;;  %v1201_v52 = vsel %vm1174_vm2, %v1046_v43, %v1200_v44  ;;  %vm985_vm13 = vcmp.lt.f32.partialorder %v649_v46, -10000.0  ;;  %v670_v57 = vmax.f32 %v668_v37, %v669_v45 }
  0x76   : > { %v658_v54 = vmax.f32 %v656_v41, %v657_v47  ;;  %v1202_v55 = vsel %vm1176_vm3, %v1047_v50, %v1201_v52  ;;  %v665_v58 = vmax.f32 %v663_v42, %v664_v49  ;;  %v1049_v59 = vsel %vm985_vm13, 0.0, %v649_v46  ;;  %v330_v42 = vld [vmem:[%s2017_s23 + $0x278] sm:$0xff] }
  0x77   : > { %v1203_v60 = vsel %vm1178_vm4, %v1048_v51, %v1202_v55  ;;  %v677_v63 = vsel %vm379_vm0, %v317_v48, -inf  ;;  %v671_v2 = vrot.slane %v670_v57, 4  ;;  %v678_v3 = vsel %vm379_vm0, %v318_v53, -inf }
  0x78   : > { %vm986_vm14 = vcmp.lt.f32.partialorder %v658_v54, -10000.0  ;;  %v1204_v0 = vsel %vm1180_vm5, %v1049_v59, %v1203_v60  ;;  %v666_v4 = vrot.slane %v665_v58, 1  ;;  %v679_v8 = vmax.f32 %v677_v63, %v678_v3 }
  0x79   : > { %v1050_v5 = vsel %vm986_vm14, 0.0, %v658_v54  ;;  %v686_v9 = vsel %vm379_vm0, %v319_v56, -inf  ;;  %v672_v11 = vmax.f32 %v670_v57, %v671_v2  ;;  %v687_v12 = vsel %vm379_vm0, %v320_v61, -inf }
  0x7a   : > { %v1205_v10 = vsel %vm1182_vm6, %v1050_v5, %v1204_v0  ;;  %v695_v13 = vsel %vm379_vm0, %v321_v62, -inf  ;;  %v667_v14 = vmax.f32 %v665_v58, %v666_v4  ;;  %v680_v16 = vrot.slane %v679_v8, 4 }
  0x7b   : > { %v688_v17 = vmax.f32 %v686_v9, %v687_v12  ;;  %v696_v18 = vsel %vm379_vm0, %v322_v1, -inf  ;;  %v673_v19 = vrot.slane %v672_v11, 2  ;;  %v704_v21 = vsel %vm379_vm0, %v323_v6, -inf }
  0x7c   : > { %v697_v20 = vmax.f32 %v695_v13, %v696_v18  ;;  %v705_v22 = vsel %vm379_vm0, %v324_v7, -inf  ;;  %vm987_vm15 = vcmp.lt.f32.partialorder %v667_v14, -10000.0  ;;  %v681_v25 = vmax.f32 %v679_v8, %v680_v16  ;;  %v332_v16 = vld [vmem:[%s2017_s23 + $0x288] sm:$0xff] }
  0x7d   : > { %v689_v26 = vrot.slane %v688_v17, 4  ;;  %v706_v27 = vmax.f32 %v704_v21, %v705_v22  ;;  %v1051_v28 = vsel %vm987_vm15, 0.0, %v667_v14  ;;  %v674_v29 = vmax.f32 %v672_v11, %v673_v19 }
  0x7e   : > { %v698_v30 = vrot.slane %v697_v20, 4  ;;  %v713_v31 = vsel %vm379_vm0, %v325_v15, -inf  ;;  %v1206_v32 = vsel %vm1184_vm10, %v1051_v28, %v1205_v10  ;;  %v682_v35 = vrot.slane %v681_v25, 2  ;;  %v331_v15 = vld [vmem:[%s2017_s23 + $0x280] sm:$0xff] }
  0x7f   : > { %v690_v36 = vmax.f32 %v688_v17, %v689_v26  ;;  %v707_v37 = vrot.slane %v706_v27, 4  ;;  %1690 = vmatmul.mubr.msk.f32.gmra.mrb[2].mxu1 %vm379_vm0, %v1206_v32  ;;  %v675_v38 = vrot.slane %v674_v29, 1  ;;  %v714_v40 = vsel %vm379_vm0, %v326_v23, -inf  ;;  %v335_v26 = vld [vmem:[%s2017_s23 + $0x2a0] sm:$0xff] }
  0x80   : > { %v699_v39 = vmax.f32 %v697_v20, %v698_v30  ;;  %v722_v41 = vsel %vm379_vm0, %v327_v24, -inf  ;;  %v683_v43 = vmax.f32 %v681_v25, %v682_v35  ;;  %v715_v46 = vmax.f32 %v713_v31, %v714_v40  ;;  %v333_v20 = vld [vmem:[%s2017_s23 + $0x290] sm:$0xff]  ;;  %v334_v25 = vld [vmem:[%s2017_s23 + $0x298] sm:$0xff] }
  0x81   : > { %v691_v44 = vrot.slane %v690_v36, 2  ;;  %v708_v45 = vmax.f32 %v706_v27, %v707_v37  ;;  %v676_v47 = vmax.f32 %v674_v29, %v675_v38  ;;  %v723_v49 = vsel %vm379_vm0, %v328_v33, -inf  ;;  %v336_v27 = vld [vmem:[%s2017_s23 + $0x2a8] sm:$0xff]  ;;  %v338_v37 = vld [vmem:[%s2017_s23 + $0x2b8] sm:$0xff] }
  0x82   : > { %v700_v48 = vrot.slane %v699_v39, 2  ;;  %v731_v50 = vsel %vm379_vm0, %v329_v34, -inf  ;;  %v684_v51 = vrot.slane %v683_v43, 1  ;;  %v716_v54 = vrot.slane %v715_v46, 4  ;;  %v337_v34 = vld [vmem:[%s2017_s23 + $0x2b0] sm:$0xff] }
  0x83   : > { %v692_v52 = vmax.f32 %v690_v36, %v691_v44  ;;  %v709_v53 = vrot.slane %v708_v45, 2  ;;  %v724_v56 = vmax.f32 %v722_v41, %v723_v49  ;;  %v732_v57 = vsel %vm379_vm0, %v330_v42, -inf }
  0x84   : > { %v701_v55 = vmax.f32 %v699_v39, %v700_v48  ;;  %vm988_vm7 = vcmp.lt.f32.partialorder %v676_v47, -10000.0  ;;  %v685_v58 = vmax.f32 %v683_v43, %v684_v51  ;;  %v717_v61 = vmax.f32 %v715_v46, %v716_v54  ;;  %v339_v46 = vld [vmem:[%s2017_s23 + $0x2c0] sm:$0xff]  ;;  %v340_v54 = vld [vmem:[%s2017_s23 + $0x2c8] sm:$0xff] }
  0x85   : > { %v693_v59 = vrot.slane %v692_v52, 1  ;;  %v710_v60 = vmax.f32 %v708_v45, %v709_v53  ;;  %v725_v63 = vrot.slane %v724_v56, 4  ;;  %v733_v0 = vmax.f32 %v731_v50, %v732_v57 }
  0x86   : > { %v702_v62 = vrot.slane %v701_v55, 1  ;;  %v1052_v1 = vsel %vm988_vm7, 0.0, %v676_v47  ;;  %v718_v4 = vrot.slane %v717_v61, 2  ;;  %vm989_vm8 = vcmp.lt.f32.partialorder %v685_v58, -10000.0 }
  0x87   : > { %v694_v2 = vmax.f32 %v692_v52, %v693_v59  ;;  %v711_v3 = vrot.slane %v710_v60, 1  ;;  %v726_v6 = vmax.f32 %v724_v56, %v725_v63  ;;  %v734_v7 = vrot.slane %v733_v0, 4  ;;  %v342_v63 = vld [vmem:[%s2017_s23 + $0x2d8] sm:$0xff] }
  0x88   : > { %v703_v5 = vmax.f32 %v701_v55, %v702_v62  ;;  %v1053_v8 = vsel %vm989_vm8, 0.0, %v685_v58  ;;  %v719_v10 = vmax.f32 %v717_v61, %v718_v4  ;;  %v740_v30 = vsel %vm379_vm0, %v331_v15, -inf  ;;  %v341_v55 = vld [vmem:[%s2017_s23 + $0x2d0] sm:$0xff] }
  0x89   : > { %v712_v9 = vmax.f32 %v710_v60, %v711_v3  ;;  %vm990_vm9 = vcmp.lt.f32.partialorder %v694_v2, -10000.0  ;;  %v1207_v11 = vsel %vm1172_vm1, %v1053_v8, %v1052_v1  ;;  %v727_v12 = vrot.slane %v726_v6, 2  ;;  %v344_v1 = vld [vmem:[%s2017_s23 + $0x2e8] sm:$0xff] }
  0x8a   : > { %v735_v13 = vmax.f32 %v733_v0, %v734_v7  ;;  %vm991_vm11 = vcmp.lt.f32.partialorder %v703_v5, -10000.0  ;;  %v1054_v14 = vsel %vm990_vm9, 0.0, %v694_v2  ;;  %v720_v17 = vrot.slane %v719_v10, 1  ;;  %v343_v0 = vld [vmem:[%s2017_s23 + $0x2e0] sm:$0xff] }
  0x8b   : > { %vm992_vm12 = vcmp.lt.f32.partialorder %v712_v9, -10000.0  ;;  %v1055_v18 = vsel %vm991_vm11, 0.0, %v703_v5  ;;  %v1208_v19 = vsel %vm1174_vm2, %v1054_v14, %v1207_v11  ;;  %v728_v21 = vmax.f32 %v726_v6, %v727_v12 }
  0x8c   : > { %v736_v22 = vrot.slane %v735_v13, 2  ;;  %v1056_v23 = vsel %vm992_vm12, 0.0, %v712_v9  ;;  %v1209_v24 = vsel %vm1176_vm3, %v1055_v18, %v1208_v19  ;;  %v721_v28 = vmax.f32 %v719_v10, %v720_v17  ;;  %v345_v9 = vld [vmem:[%s2017_s23 + $0x2f0] sm:$0xff]  ;;  %v346_v18 = vld [vmem:[%s2017_s23 + $0x2f8] sm:$0xff] }
  0x8d   : > { %v1210_v29 = vsel %vm1178_vm4, %v1056_v23, %v1209_v24  ;;  %v741_v31 = vsel %vm379_vm0, %v332_v16, -inf  ;;  %v729_v32 = vrot.slane %v728_v21, 1  ;;  %v749_v36 = vsel %vm379_vm0, %v333_v20, -inf }
  0x8e   : > { %v737_v33 = vmax.f32 %v735_v13, %v736_v22  ;;  %v742_v35 = vmax.f32 %v740_v30, %v741_v31  ;;  %vm993_vm13 = vcmp.lt.f32.partialorder %v721_v28, -10000.0  ;;  %v750_v38 = vsel %vm379_vm0, %v334_v25, -inf }
  0x8f   : > { %v758_v39 = vsel %vm379_vm0, %v335_v26, -inf  ;;  %v759_v40 = vsel %vm379_vm0, %v336_v27, -inf  ;;  %v730_v41 = vmax.f32 %v728_v21, %v729_v32  ;;  %v1057_v43 = vsel %vm993_vm13, 0.0, %v721_v28 }
  0x90   : > { %v738_v42 = vrot.slane %v737_v33, 1  ;;  %v743_v44 = vrot.slane %v742_v35, 4  ;;  %v1211_v45 = vsel %vm1180_vm5, %v1057_v43, %v1210_v29  ;;  %v751_v47 = vmax.f32 %v749_v36, %v750_v38 }
  0x91   : > { %v760_v48 = vmax.f32 %v758_v39, %v759_v40  ;;  %v767_v49 = vsel %vm379_vm0, %v337_v34, -inf  ;;  %vm994_vm14 = vcmp.lt.f32.partialorder %v730_v41, -10000.0  ;;  %v768_v52 = vsel %vm379_vm0, %v338_v37, -inf }
  0x92   : > { %v739_v50 = vmax.f32 %v737_v33, %v738_v42  ;;  %v744_v51 = vmax.f32 %v742_v35, %v743_v44  ;;  %v1058_v53 = vsel %vm994_vm14, 0.0, %v730_v41  ;;  %v752_v56 = vrot.slane %v751_v47, 4 }
  0x93   : > { %v761_v57 = vrot.slane %v760_v48, 4  ;;  %v769_v58 = vmax.f32 %v767_v49, %v768_v52  ;;  %v1212_v59 = vsel %vm1182_vm6, %v1058_v53, %v1211_v45  ;;  %v776_v61 = vsel %vm379_vm0, %v339_v46, -inf  ;;  %v348_v49 = vld [vmem:[%s2017_s23 + $0x308] sm:$0xff] }
  0x94   : > { %vm995_vm15 = vcmp.lt.f32.partialorder %v739_v50, -10000.0  ;;  %v745_v60 = vrot.slane %v744_v51, 2  ;;  %v753_v2 = vmax.f32 %v751_v47, %v752_v56  ;;  %v777_v7 = vsel %vm379_vm0, %v340_v54, -inf }
  0x95   : > { %v1059_v62 = vsel %vm995_vm15, 0.0, %v739_v50  ;;  %v762_v3 = vmax.f32 %v760_v48, %v761_v57  ;;  %v770_v4 = vrot.slane %v769_v58, 4  ;;  %v785_v8 = vsel %vm379_vm0, %v341_v55, -inf  ;;  %v347_v48 = vld [vmem:[%s2017_s23 + $0x300] sm:$0xff]  ;;  %v349_v57 = vld [vmem:[%s2017_s23 + $0x310] sm:$0xff] }
  0x96   : > { %v1213_v5 = vsel %vm1184_vm10, %v1059_v62, %v1212_v59  ;;  %v746_v6 = vmax.f32 %v744_v51, %v745_v60  ;;  %v754_v10 = vrot.slane %v753_v2, 2  ;;  %v778_v13 = vmax.f32 %v776_v61, %v777_v7 }
  0x97   : > { %1692 = vmatprep.mubr.msk.f32.mxu1 %vm379_vm0, %v1213_v5  ;;  %v763_v11 = vrot.slane %v762_v3, 2  ;;  %v771_v12 = vmax.f32 %v769_v58, %v770_v4  ;;  %v786_v15 = vsel %vm379_vm0, %v342_v63, -inf  ;;  %v794_v16 = vsel %vm379_vm0, %v343_v0, -inf  ;;  %v350_v58 = vld [vmem:[%s2017_s23 + $0x318] sm:$0xff]  ;;  %v352_v4 = vld [vmem:[%s2017_s23 + $0x328] sm:$0xff] }
  0x98   : > { %v747_v14 = vrot.slane %v746_v6, 1  ;;  %v795_v17 = vsel %vm379_vm0, %v344_v1, -inf  ;;  %v755_v19 = vmax.f32 %v753_v2, %v754_v10  ;;  %v779_v22 = vrot.slane %v778_v13, 4 }
  0x99   : > { %v764_v20 = vmax.f32 %v762_v3, %v763_v11  ;;  %v772_v21 = vrot.slane %v771_v12, 2  ;;  %v787_v24 = vmax.f32 %v785_v8, %v786_v15  ;;  %v796_v25 = vmax.f32 %v794_v16, %v795_v17  ;;  %v351_v3 = vld [vmem:[%s2017_s23 + $0x320] sm:$0xff] }
  0x9a   : > { %v748_v23 = vmax.f32 %v746_v6, %v747_v14  ;;  %v803_v26 = vsel %vm379_vm0, %v345_v9, -inf  ;;  %v756_v27 = vrot.slane %v755_v19, 1  ;;  %v780_v30 = vmax.f32 %v778_v13, %v779_v22  ;;  %v353_v13 = vld [vmem:[%s2017_s23 + $0x330] sm:$0xff]  ;;  %v355_v22 = vld [vmem:[%s2017_s23 + $0x340] sm:$0xff] }
  0x9b   : > { %v765_v28 = vrot.slane %v764_v20, 1  ;;  %v773_v29 = vmax.f32 %v771_v12, %v772_v21  ;;  %v788_v31 = vrot.slane %v787_v24, 4  ;;  %v797_v32 = vrot.slane %v796_v25, 4 }
  0x9c   : > { %v804_v33 = vsel %vm379_vm0, %v346_v18, -inf  ;;  %vm996_vm7 = vcmp.lt.f32.partialorder %v748_v23, -10000.0  ;;  %v757_v34 = vmax.f32 %v755_v19, %v756_v27  ;;  %v781_v37 = vrot.slane %v780_v30, 2  ;;  %v354_v18 = vld [vmem:[%s2017_s23 + $0x338] sm:$0xff]  ;;  %v356_v27 = vld [vmem:[%s2017_s23 + $0x348] sm:$0xff] }
  0x9d   : > { %v766_v35 = vmax.f32 %v764_v20, %v765_v28  ;;  %v774_v36 = vrot.slane %v773_v29, 1  ;;  %v789_v38 = vmax.f32 %v787_v24, %v788_v31  ;;  %v798_v39 = vmax.f32 %v796_v25, %v797_v32 }
  0x9e   : > { %v805_v40 = vmax.f32 %v803_v26, %v804_v33  ;;  %v1060_v41 = vsel %vm996_vm7, 0.0, %v748_v23  ;;  %v782_v43 = vmax.f32 %v780_v30, %v781_v37  ;;  %vm997_vm8 = vcmp.lt.f32.partialorder %v757_v34, -10000.0 }
  0x9f   : > { %v775_v42 = vmax.f32 %v773_v29, %v774_v36  ;;  %vm998_vm9 = vcmp.lt.f32.partialorder %v766_v35, -10000.0  ;;  %v790_v44 = vrot.slane %v789_v38, 2  ;;  %v799_v45 = vrot.slane %v798_v39, 2 }
  0xa0   : > { %v806_v46 = vrot.slane %v805_v40, 4  ;;  %v1061_v47 = vsel %vm997_vm8, 0.0, %v757_v34  ;;  %v783_v50 = vrot.slane %v782_v43, 1  ;;  %v1062_v51 = vsel %vm998_vm9, 0.0, %v766_v35  ;;  %v357_v34 = vld [vmem:[%s2017_s23 + $0x350] sm:$0xff]  ;;  %v358_v35 = vld [vmem:[%s2017_s23 + $0x358] sm:$0xff] }
  0xa1   : > { %vm999_vm11 = vcmp.lt.f32.partialorder %v775_v42, -10000.0  ;;  %v1214_v52 = vsel %vm1172_vm1, %v1061_v47, %v1060_v41  ;;  %v791_v53 = vmax.f32 %v789_v38, %v790_v44  ;;  %v800_v54 = vmax.f32 %v798_v39, %v799_v45  ;;  %v359_v44 = vld [vmem:[%s2017_s23 + $0x360] sm:$0xff]  ;;  %v360_v45 = vld [vmem:[%s2017_s23 + $0x368] sm:$0xff] }
  0xa2   : > { %v807_v55 = vmax.f32 %v805_v40, %v806_v46  ;;  %v1063_v56 = vsel %vm999_vm11, 0.0, %v775_v42  ;;  %v784_v59 = vmax.f32 %v782_v43, %v783_v50  ;;  %v1215_v60 = vsel %vm1174_vm2, %v1062_v51, %v1214_v52 }
  0xa3   : > { %v812_v61 = vsel %vm379_vm0, %v347_v48, -inf  ;;  %v813_v62 = vsel %vm379_vm0, %v348_v49, -inf  ;;  %v792_v63 = vrot.slane %v791_v53, 1  ;;  %v801_v0 = vrot.slane %v800_v54, 1 }
  0xa4   : > { %v808_v1 = vrot.slane %v807_v55, 2  ;;  %v1216_v2 = vsel %vm1176_vm3, %v1063_v56, %v1215_v60  ;;  %vm1000_vm12 = vcmp.lt.f32.partialorder %v784_v59, -10000.0  ;;  %v814_v5 = vmax.f32 %v812_v61, %v813_v62 }
  0xa5   : > { %v821_v6 = vsel %vm379_vm0, %v349_v57, -inf  ;;  %v822_v7 = vsel %vm379_vm0, %v350_v58, -inf  ;;  %v793_v8 = vmax.f32 %v791_v53, %v792_v63  ;;  %v802_v9 = vmax.f32 %v800_v54, %v801_v0  ;;  %v361_v53 = vld [vmem:[%s2017_s23 + $0x370] sm:$0xff]  ;;  %v362_v54 = vld [vmem:[%s2017_s23 + $0x378] sm:$0xff] }
  0xa6   : > { %v809_v10 = vmax.f32 %v807_v55, %v808_v1  ;;  %v1064_v11 = vsel %vm1000_vm12, 0.0, %v784_v59  ;;  %v815_v14 = vrot.slane %v814_v5, 4  ;;  %v823_v15 = vmax.f32 %v821_v6, %v822_v7 }
  0xa7   : > { %v1217_v12 = vsel %vm1178_vm4, %v1064_v11, %v1216_v2  ;;  %v830_v16 = vsel %vm379_vm0, %v351_v3, -inf  ;;  %vm1001_vm13 = vcmp.lt.f32.partialorder %v793_v8, -10000.0  ;;  %vm1002_vm14 = vcmp.lt.f32.partialorder %v802_v9, -10000.0 }
  0xa8   : > { %v810_v17 = vrot.slane %v809_v10, 1  ;;  %v831_v19 = vsel %vm379_vm0, %v352_v4, -inf  ;;  %v1065_v20 = vsel %vm1001_vm13, 0.0, %v793_v8  ;;  %v1066_v21 = vsel %vm1002_vm14, 0.0, %v802_v9 }
  0xa9   : > { %v816_v23 = vmax.f32 %v814_v5, %v815_v14  ;;  %v824_v24 = vrot.slane %v823_v15, 4  ;;  %v1218_v26 = vsel %vm1180_vm5, %v1065_v20, %v1217_v12  ;;  %v832_v28 = vmax.f32 %v830_v16, %v831_v19 }
  0xaa   : > { %v811_v25 = vmax.f32 %v809_v10, %v810_v17  ;;  %v839_v29 = vsel %vm379_vm0, %v353_v13, -inf  ;;  %v1219_v30 = vsel %vm1182_vm6, %v1066_v21, %v1218_v26  ;;  %v840_v33 = vsel %vm379_vm0, %v354_v18, -inf }
  0xab   : > { %v817_v31 = vrot.slane %v816_v23, 2  ;;  %v825_v32 = vmax.f32 %v823_v15, %v824_v24  ;;  %v833_v36 = vrot.slane %v832_v28, 4  ;;  %v841_v37 = vmax.f32 %v839_v29, %v840_v33  ;;  %v363_v24 = vld [vmem:[%s2017_s23 + $0x380] sm:$0xff]  ;;  %v364_v29 = vld [vmem:[%s2017_s23 + $0x388] sm:$0xff] }
  0xac   : > { %vm1003_vm15 = vcmp.lt.f32.partialorder %v811_v25, -10000.0  ;;  %v848_v38 = vsel %vm379_vm0, %v355_v22, -inf  ;;  %v849_v42 = vsel %vm379_vm0, %v356_v27, -inf  ;;  %v857_v51 = vsel %vm379_vm0, %v357_v34, -inf }
  0xad   : > { %v1067_v39 = vsel %vm1003_vm15, 0.0, %v811_v25  ;;  %v818_v40 = vmax.f32 %v816_v23, %v817_v31  ;;  %v826_v41 = vrot.slane %v825_v32, 2  ;;  %v834_v46 = vmax.f32 %v832_v28, %v833_v36  ;;  %v365_v36 = vld [vmem:[%s2017_s23 + $0x390] sm:$0xff] }
  0xae   : > { %v1220_v43 = vsel %vm1184_vm10, %v1067_v39, %v1219_v30  ;;  %v842_v47 = vrot.slane %v841_v37, 4  ;;  %v850_v48 = vmax.f32 %v848_v38, %v849_v42  ;;  %v858_v52 = vsel %vm379_vm0, %v358_v35, -inf }
  0xaf   : > { %1693 = vmatmul.mubr.msk.f32.gmra.mrb[4].mxu1 %vm379_vm0, %v1220_v43  ;;  %v819_v49 = vrot.slane %v818_v40, 1  ;;  %v827_v50 = vmax.f32 %v825_v32, %v826_v41  ;;  %v835_v55 = vrot.slane %v834_v46, 2  ;;  %v859_v58 = vmax.f32 %v857_v51, %v858_v52 }
  0xb0   : > { %v843_v56 = vmax.f32 %v841_v37, %v842_v47  ;;  %v851_v57 = vrot.slane %v850_v48, 4  ;;  %v866_v61 = vsel %vm379_vm0, %v359_v44, -inf  ;;  %v867_v62 = vsel %vm379_vm0, %v360_v45, -inf  ;;  %v366_v37 = vld [vmem:[%s2017_s23 + $0x398] sm:$0xff]  ;;  %v367_v45 = vld [vmem:[%s2017_s23 + $0x3a0] sm:$0xff] }
  0xb1   : > { %v820_v59 = vmax.f32 %v818_v40, %v819_v49  ;;  %v828_v60 = vrot.slane %v827_v50, 1  ;;  %v836_v63 = vmax.f32 %v834_v46, %v835_v55  ;;  %v860_v2 = vrot.slane %v859_v58, 4  ;;  %v368_v46 = vld [vmem:[%s2017_s23 + $0x3a8] sm:$0xff]  ;;  %v370_v55 = vld [vmem:[%s2017_s23 + $0x3b8] sm:$0xff] }
  0xb2   : > { %v844_v0 = vrot.slane %v843_v56, 2  ;;  %v852_v1 = vmax.f32 %v850_v48, %v851_v57  ;;  %v868_v4 = vmax.f32 %v866_v61, %v867_v62  ;;  %v875_v5 = vsel %vm379_vm0, %v361_v53, -inf  ;;  %v371_v62 = vld [vmem:[%s2017_s23 + $0x3c0] sm:$0xff] }
  0xb3   : > { %v829_v3 = vmax.f32 %v827_v50, %v828_v60  ;;  %v876_v6 = vsel %vm379_vm0, %v362_v54, -inf  ;;  %v837_v7 = vrot.slane %v836_v63, 1  ;;  %v861_v10 = vmax.f32 %v859_v58, %v860_v2  ;;  %v369_v54 = vld [vmem:[%s2017_s23 + $0x3b0] sm:$0xff]  ;;  %v372_v2 = vld [vmem:[%s2017_s23 + $0x3c8] sm:$0xff] }
  0xb4   : > { %v845_v8 = vmax.f32 %v843_v56, %v844_v0  ;;  %v853_v9 = vrot.slane %v852_v1, 2  ;;  %v869_v11 = vrot.slane %v868_v4, 4  ;;  %v877_v12 = vmax.f32 %v875_v5, %v876_v6 }
  0xb5   : > { %vm1004_vm7 = vcmp.lt.f32.partialorder %v820_v59, -10000.0  ;;  %vm1005_vm8 = vcmp.lt.f32.partialorder %v829_v3, -10000.0  ;;  %v838_v13 = vmax.f32 %v836_v63, %v837_v7  ;;  %v862_v16 = vrot.slane %v861_v10, 2  ;;  %v373_v7 = vld [vmem:[%s2017_s23 + $0x3d0] sm:$0xff] }
  0xb6   : > { %v846_v14 = vrot.slane %v845_v8, 1  ;;  %v854_v15 = vmax.f32 %v852_v1, %v853_v9  ;;  %v870_v17 = vmax.f32 %v868_v4, %v869_v11  ;;  %v878_v18 = vrot.slane %v877_v12, 4  ;;  %v374_v11 = vld [vmem:[%s2017_s23 + $0x3d8] sm:$0xff] }
  0xb7   : > { %v1068_v19 = vsel %vm1004_vm7, 0.0, %v820_v59  ;;  %v1069_v20 = vsel %vm1005_vm8, 0.0, %v829_v3  ;;  %v863_v23 = vmax.f32 %v861_v10, %v862_v16  ;;  %vm1006_vm9 = vcmp.lt.f32.partialorder %v838_v13, -10000.0 }
  0xb8   : > { %v847_v21 = vmax.f32 %v845_v8, %v846_v14  ;;  %v855_v22 = vrot.slane %v854_v15, 1  ;;  %v871_v25 = vrot.slane %v870_v17, 2  ;;  %v879_v26 = vmax.f32 %v877_v12, %v878_v18  ;;  %v375_v12 = vld [vmem:[%s2017_s23 + $0x3e0] sm:$0xff] }
  0xb9   : > { %v1070_v27 = vsel %vm1006_vm9, 0.0, %v838_v13  ;;  %v1221_v28 = vsel %vm1172_vm1, %v1069_v20, %v1068_v19  ;;  %v864_v31 = vrot.slane %v863_v23, 1  ;;  %v884_v38 = vsel %vm379_vm0, %v363_v24, -inf  ;;  %v376_v20 = vld [vmem:[%s2017_s23 + $0x3e8] sm:$0xff] }
  0xba   : > { %v856_v30 = vmax.f32 %v854_v15, %v855_v22  ;;  %vm1007_vm11 = vcmp.lt.f32.partialorder %v847_v21, -10000.0  ;;  %v1222_v32 = vsel %vm1174_vm2, %v1070_v27, %v1221_v28  ;;  %v872_v33 = vmax.f32 %v870_v17, %v871_v25 }
  0xbb   : > { %v880_v34 = vrot.slane %v879_v26, 2  ;;  %v1071_v35 = vsel %vm1007_vm11, 0.0, %v847_v21  ;;  %v865_v39 = vmax.f32 %v863_v23, %v864_v31  ;;  %v885_v41 = vsel %vm379_vm0, %v364_v29, -inf  ;;  %v377_v21 = vld [vmem:[%s2017_s23 + $0x3f0] sm:$0xff] }
  0xbc   : > { %vm1008_vm12 = vcmp.lt.f32.partialorder %v856_v30, -10000.0  ;;  %v1223_v40 = vsel %vm1176_vm3, %v1071_v35, %v1222_v32  ;;  %v873_v42 = vrot.slane %v872_v33, 1  ;;  %v886_v47 = vmax.f32 %v884_v38, %v885_v41 }
  0xbd   : > { %v881_v43 = vmax.f32 %v879_v26, %v880_v34  ;;  %v1072_v44 = vsel %vm1008_vm12, 0.0, %v856_v30  ;;  %vm1009_vm13 = vcmp.lt.f32.partialorder %v865_v39, -10000.0  ;;  %v893_v49 = vsel %vm379_vm0, %v365_v36, -inf  ;;  %v378_v30 = vld [vmem:[%s2017_s23 + $0x3f8] sm:$0xff] }
  0xbe   : > { %v1224_v48 = vsel %vm1178_vm4, %v1072_v44, %v1223_v40  ;;  %v894_v50 = vsel %vm379_vm0, %v366_v37, -inf  ;;  %v874_v51 = vmax.f32 %v872_v33, %v873_v42  ;;  %v1073_v53 = vsel %vm1009_vm13, 0.0, %v865_v39 }
  0xbf   : > { %v882_v52 = vrot.slane %v881_v43, 1  ;;  %v887_v56 = vrot.slane %v886_v47, 4  ;;  %v1225_v57 = vsel %vm1180_vm5, %v1073_v53, %v1224_v48  ;;  %v895_v58 = vmax.f32 %v893_v49, %v894_v50 }
  0xc0   : > { %v902_v59 = vsel %vm379_vm0, %v367_v45, -inf  ;;  %v903_v60 = vsel %vm379_vm0, %v368_v46, -inf  ;;  %vm1010_vm14 = vcmp.lt.f32.partialorder %v874_v51, -10000.0  ;;  %v911_v4 = vsel %vm379_vm0, %v369_v54, -inf }
  0xc1   : > { %v883_v61 = vmax.f32 %v881_v43, %v882_v52  ;;  %v888_v63 = vmax.f32 %v886_v47, %v887_v56  ;;  %v904_v0 = vmax.f32 %v902_v59, %v903_v60  ;;  %v1074_v1 = vsel %vm1010_vm14, 0.0, %v874_v51 }
  0xc2   : > { %v896_v3 = vrot.slane %v895_v58, 4  ;;  %v912_v5 = vsel %vm379_vm0, %v370_v55, -inf  ;;  %v1226_v6 = vsel %vm1182_vm6, %v1074_v1, %v1225_v57  ;;  %v920_v15 = vsel %vm379_vm0, %v371_v62, -inf }
  0xc3   : > { %vm1011_vm15 = vcmp.lt.f32.partialorder %v883_v61, -10000.0  ;;  %v889_v8 = vrot.slane %v888_v63, 2  ;;  %v905_v9 = vrot.slane %v904_v0, 4  ;;  %v913_v14 = vmax.f32 %v911_v4, %v912_v5 }
  0xc4   : > { %v1075_v10 = vsel %vm1011_vm15, 0.0, %v883_v61  ;;  %v897_v13 = vmax.f32 %v895_v58, %v896_v3  ;;  %v921_v19 = vsel %vm379_vm0, %v372_v2, -inf  ;;  %v929_v25 = vsel %vm379_vm0, %v373_v7, -inf }
  0xc5   : > { %v1227_v16 = vsel %vm1184_vm10, %v1075_v10, %v1226_v6  ;;  %v890_v17 = vmax.f32 %v888_v63, %v889_v8  ;;  %v906_v18 = vmax.f32 %v904_v0, %v905_v9  ;;  %v914_v23 = vrot.slane %v913_v14, 4 }
  0xc6   : > { %1695 = vmatprep.mubr.msk.f32.mxu1 %vm379_vm0, %v1227_v16  ;;  %v898_v22 = vrot.slane %v897_v13, 2  ;;  %v922_v24 = vmax.f32 %v920_v15, %v921_v19  ;;  %v930_v28 = vsel %vm379_vm0, %v374_v11, -inf  ;;  %v938_v29 = vsel %vm379_vm0, %v375_v12, -inf }
  0xc7   : > { %v891_v26 = vrot.slane %v890_v17, 1  ;;  %v907_v27 = vrot.slane %v906_v18, 2  ;;  %v915_v32 = vmax.f32 %v913_v14, %v914_v23  ;;  %v931_v34 = vmax.f32 %v929_v25, %v930_v28 }
  0xc8   : > { %v899_v31 = vmax.f32 %v897_v13, %v898_v22  ;;  %v923_v33 = vrot.slane %v922_v24, 4  ;;  %v939_v37 = vsel %vm379_vm0, %v376_v20, -inf  ;;  %v947_v38 = vsel %vm379_vm0, %v377_v21, -inf }
  0xc9   : > { %v892_v35 = vmax.f32 %v890_v17, %v891_v26  ;;  %v908_v36 = vmax.f32 %v906_v18, %v907_v27  ;;  %v916_v40 = vrot.slane %v915_v32, 2  ;;  %v932_v42 = vrot.slane %v931_v34, 4 }
  0xca   : > { %v900_v39 = vrot.slane %v899_v31, 1  ;;  %v924_v41 = vmax.f32 %v922_v24, %v923_v33  ;;  %v940_v44 = vmax.f32 %v938_v29, %v939_v37  ;;  %v948_v45 = vsel %vm379_vm0, %v378_v30, -inf }
  0xcb   : > { %v909_v43 = vrot.slane %v908_v36, 1  ;;  %vm1012_vm7 = vcmp.lt.f32.partialorder %v892_v35, -10000.0  ;;  %v917_v47 = vmax.f32 %v915_v32, %v916_v40  ;;  %v933_v49 = vmax.f32 %v931_v34, %v932_v42  ;;  %v1630_v32 = vld [vmem:[%s2426_s4] ss:$0 sm:$0xff] }
  0xcc   : > { %v901_v46 = vmax.f32 %v899_v31, %v900_v39  ;;  %v925_v48 = vrot.slane %v924_v41, 2  ;;  %v941_v51 = vrot.slane %v940_v44, 4  ;;  %v949_v52 = vmax.f32 %v947_v38, %v948_v45 }
  0xcd   : > { %v910_v50 = vmax.f32 %v908_v36, %v909_v43  ;;  %v1076_v53 = vsel %vm1012_vm7, 0.0, %v892_v35  ;;  %v918_v54 = vrot.slane %v917_v47, 1  ;;  %v934_v56 = vrot.slane %v933_v49, 2 }
  0xce   : > { %v926_v55 = vmax.f32 %v924_v41, %v925_v48  ;;  %vm1013_vm8 = vcmp.lt.f32.partialorder %v901_v46, -10000.0  ;;  %v942_v57 = vmax.f32 %v940_v44, %v941_v51  ;;  %v950_v58 = vrot.slane %v949_v52, 4 }
  0xcf   : > { %vm1014_vm9 = vcmp.lt.f32.partialorder %v910_v50, -10000.0  ;;  %v1077_v59 = vsel %vm1013_vm8, 0.0, %v901_v46  ;;  %v919_v60 = vmax.f32 %v917_v47, %v918_v54  ;;  %v935_v62 = vmax.f32 %v933_v49, %v934_v56 }
  0xd0   : > { %v927_v61 = vrot.slane %v926_v55, 1  ;;  %v1078_v63 = vsel %vm1014_vm9, 0.0, %v910_v50  ;;  %v943_v0 = vrot.slane %v942_v57, 2  ;;  %v951_v1 = vmax.f32 %v949_v52, %v950_v58 }
  0xd1   : > { %v1228_v2 = vsel %vm1172_vm1, %v1077_v59, %v1076_v53  ;;  %v936_v4 = vrot.slane %v935_v62, 1  ;;  %vm1015_vm11 = vcmp.lt.f32.partialorder %v919_v60, -10000.0 }
  0xd2   : > { %v928_v3 = vmax.f32 %v926_v55, %v927_v61  ;;  %v1229_v5 = vsel %vm1174_vm2, %v1078_v63, %v1228_v2  ;;  %v944_v6 = vmax.f32 %v942_v57, %v943_v0  ;;  %v952_v7 = vrot.slane %v951_v1, 2 }
  0xd3   : > { %v1079_v8 = vsel %vm1015_vm11, 0.0, %v919_v60  ;;  %v937_v9 = vmax.f32 %v935_v62, %v936_v4 }
  0xd4   : > { %vm1016_vm12 = vcmp.lt.f32.partialorder %v928_v3, -10000.0  ;;  %v1230_v10 = vsel %vm1176_vm3, %v1079_v8, %v1229_v5  ;;  %v945_v11 = vrot.slane %v944_v6, 1  ;;  %v953_v12 = vmax.f32 %v951_v1, %v952_v7 }
  0xd5   : > { %v1080_v13 = vsel %vm1016_vm12, 0.0, %v928_v3  ;;  %vm1017_vm13 = vcmp.lt.f32.partialorder %v937_v9, -10000.0 }
  0xd6   : > { %v1231_v14 = vsel %vm1178_vm4, %v1080_v13, %v1230_v10  ;;  %v946_v15 = vmax.f32 %v944_v6, %v945_v11  ;;  %v954_v16 = vrot.slane %v953_v12, 1  ;;  %v1081_v17 = vsel %vm1017_vm13, 0.0, %v937_v9 }
  0xd7   : > { %v1232_v18 = vsel %vm1180_vm5, %v1081_v17, %v1231_v14 }
  0xd8   : > { %v955_v19 = vmax.f32 %v953_v12, %v954_v16  ;;  %vm1018_vm1 = vcmp.lt.f32.partialorder %v946_v15, -10000.0 }
  0xd9   : > { %v1082_v20 = vsel %vm1018_vm1, 0.0, %v946_v15 }
  0xda   : > { %vm1019_vm2 = vcmp.lt.f32.partialorder %v955_v19, -10000.0  ;;  %v1233_v21 = vsel %vm1182_vm6, %v1082_v20, %v1232_v18 }
  0xdb   : > { %v1083_v22 = vsel %vm1019_vm2, 0.0, %v955_v19 }
  0xdc   : > { %v1234_v23 = vsel %vm1184_vm10, %v1083_v22, %v1233_v21 }
  0xdd   : > { %1696 = vmatmul.mubr.msk.f32.gmra.mrb[6].mxu1 %vm379_vm0, %v1234_v23 }
  0xf3   : > { %v1716_v24 = vpop.f32.mrb[0].mxu0 }
  0xf4   : > { %v1446_v25 = vpop.f32.mrb[1].mxu0 }
  0xf7   : > { %v1719_v26 = vpop.f32.mrb[2].mxu0 }
  0xf8   : > { %v1456_v27 = vpop.f32.mrb[3].mxu0 }
  0xfd   : > { %v1722_v28 = vpop.f32.mrb[4].mxu0 }
  0xfe   : > { %v1466_v29 = vpop.f32.mrb[5].mxu0 }
 0x10c   : > { %v1725_v30 = vpop.f32.mrb[6].mxu0 }
 0x10d   : > { %v1476_v40 = vpop.f32.mrb[7].mxu0 }
 0x121   : > { %v1688_v31 = vpop.f32.mrb[0].mxu1 }
 0x122   : > { %v1452_v33 = vadd.f32 %v1716_v24, %v1688_v31  ;;  %v1317_v34 = vpop.f32.mrb[1].mxu1 }
 0x123   : > { %v1447_v35 = vadd.f32 %v1446_v25, %v1317_v34 }
 0x124   : > { %v1493_v36 = vadd.f32 %v1630_v32, %v1452_v33 }
 0x125   : > { %v1492_v37 = vadd.f32 %v1630_v32, %v1447_v35 }
 0x126   : > { %v1501_v38 = vmax.f32 %v1493_v36, 0.0 }
 0x127   : > { %v1500_v39 = vmax.f32 %v1492_v37, 0.0 }
 0x128   : > { %1509 = vst [vmem:[%s2360_s7 + $0x8] sm:$0xff] %v1501_v38 }
 0x129   : > { %1508 = vst [vmem:[%s2360_s7] sm:$0xff] %v1500_v39 }
 0x152   : > { %v1691_v41 = vpop.f32.mrb[2].mxu1 }
 0x153   : > { %v1462_v42 = vadd.f32 %v1719_v26, %v1691_v41  ;;  %v1327_v43 = vpop.f32.mrb[3].mxu1 }
 0x154   : > { %v1457_v44 = vadd.f32 %v1456_v27, %v1327_v43 }
 0x155   : > { %v1495_v45 = vadd.f32 %v1630_v32, %v1462_v42 }
 0x156   : > { %v1494_v46 = vadd.f32 %v1630_v32, %v1457_v44 }
 0x157   : > { %v1503_v47 = vmax.f32 %v1495_v45, 0.0 }
 0x158   : > { %v1502_v48 = vmax.f32 %v1494_v46, 0.0 }
 0x159   : > { %1511 = vst [vmem:[%s2360_s7 + $0x18] sm:$0xff] %v1503_v47 }
 0x15a   : > { %1510 = vst [vmem:[%s2360_s7 + $0x10] sm:$0xff] %v1502_v48 }
 0x182   : > { %v1694_v49 = vpop.f32.mrb[4].mxu1 }
 0x183   : > { %v1472_v50 = vadd.f32 %v1722_v28, %v1694_v49  ;;  %v1337_v51 = vpop.f32.mrb[5].mxu1 }
 0x184   : > { %v1467_v52 = vadd.f32 %v1466_v29, %v1337_v51 }
 0x185   : > { %v1497_v53 = vadd.f32 %v1630_v32, %v1472_v50 }
 0x186   : > { %v1496_v54 = vadd.f32 %v1630_v32, %v1467_v52 }
 0x187   : > { %v1505_v55 = vmax.f32 %v1497_v53, 0.0 }
 0x188   : > { %v1504_v56 = vmax.f32 %v1496_v54, 0.0 }
 0x189   : > { %1513 = vst [vmem:[%s2360_s7 + $0x28] sm:$0xff] %v1505_v55 }
 0x18a   : > { %1512 = vst [vmem:[%s2360_s7 + $0x20] sm:$0xff] %v1504_v56 }
 0x1b0   : > { %v1697_v57 = vpop.f32.mrb[6].mxu1 }
 0x1b1   : > { %v1482_v58 = vadd.f32 %v1725_v30, %v1697_v57  ;;  %v1347_v59 = vpop.f32.mrb[7].mxu1 }
 0x1b2   : > { %v1477_v60 = vadd.f32 %v1476_v40, %v1347_v59 }
 0x1b3   : > { %v1499_v61 = vadd.f32 %v1630_v32, %v1482_v58 }
 0x1b4   : > { %v1498_v62 = vadd.f32 %v1630_v32, %v1477_v60 }
 0x1b5   : > { %v1507_v63 = vmax.f32 %v1499_v61, 0.0 }
 0x1b6   : > { %v1506_v0 = vmax.f32 %v1498_v62, 0.0 }
 0x1b7   : > { %1515 = vst [vmem:[%s2360_s7 + $0x38] sm:$0xff] %v1507_v63 }
 0x1b8   : > { %1514 = vst [vmem:[%s2360_s7 + $0x30] sm:$0xff] %v1506_v0 }
 0x1b9   : > { %1820 = shalt.err (!%p1817_p4)
}
 0x1ba   : > { %s1821_s17 = scalar_lea.hbm %s2373_s13, 1024  ;;  %s1825_s26 = scalar_lea.hbm %s2427_s5, 2048 }
 0x1bb   : > { %p1822_p7 = scmp.ne.s32.totalorder %s2373_s13, %s1821_s17  ;;  %p1826_p10 = scmp.lt.u32.totalorder %s2373_s13, %s2427_s5 }
 0x1bc   : > { %p1827_p11 = scmp.lt.u32.totalorder %s1825_s26, %s1821_s17  ;;  %p1829_p13 = scmp.lt.u32.totalorder %s1821_s17, %s2373_s13 }
 0x1bd   : > { %p1823_p8 = pnand %p1822_p7, %p1942_p5 }
 0x1be   : > { %p1828_p12 = por %p1827_p11, %p1826_p10 }
 0x1bf   : > { %p1824_p9 = pneg %p1823_p8 }
 0x1c0   : > { %p1830_p0 = por %p1829_p13, %p1828_p12 }
 0x1c2   : > { %p1831_p1 = pnand %p1830_p0, %p1824_p9 }
 0x1c4   : > { %1834 = shalt.err (!%p1831_p1)
}
 0x1c5   : > { %s1872_s7 = smov 128   ;;  %s1873_s8 = smov 8  }
 0x1c6   : > { %1766 = dma.vmem_to_hbm [thread:$0]  (%p1942_p5), %s2375_s9, 1024, %s2373_s13, %s2381_s14, %s1872_s7, %s1872_s7, %s1873_s8  }
 0x1c7 PF: > { %p1772_p2 = scmp.ge.s32.totalorder %s1869_s21, 2  ;;  %s1545_s25 = sand.u32 1, %s1857_s18  }
 0x1c8   : > { %s1546_s10 = scalar_lea.sflag [#allocation3], %s1545_s25 }
 0x1c9   : > { %p1769_p3 = pnand %p1772_p2, %p1946_p6 }
 0x1cb   : > { %1852 = dma.done.wait (!%p1769_p3), %s1546_s10, 1024  }
 0x1cc   : > { %1854 = vsyncadd (!%p1769_p3), %s1546_s10, 4294966272  ;;  %p15_p4 = scmp.ge.s32.totalorder %s1929_s24, 4   ;;  %s2431_s18 = smov %s1861_s19 }
 0x1cd   : > { %s2432_s19 = smov %s1865_s20  ;;  %s2433_s20 = smov %s1940_s27 }
 0x1ce   : > { %s2434_s21 = smov %s1929_s24  ;;  %17 = sbr.rel (!%p15_p4) target bundleno = 3 (0x3), region = 78 }
 0x1d5   :  { %1551 = vsyncpa [#allocation3], 1 }
 0x1d6   :  { %1553 = vsyncpa [#allocation3 + $0x1], 1 }

</bundles_post_ra>
